<compile_context>
chip_gen: v6e
topology: v6e:2x2x1
jax: 0.10.0
libtpu: 0.0.40
codegen_flags: <defaults>
</compile_context>

<pallas_src>
import math

import jax
import jax.numpy as jnp
from jax import lax
from jax.experimental import pallas as pl
from jax.experimental.pallas import tpu as pltpu


# --------------------- fused merge + LayerNorm + reduction kernel ---------------------

def _patch_merging_kernel(x_ref, g_ref, b_ref, w_ref, o_ref):
    # x_ref: (TR, 2, W2, 2C)  two row-parity slabs of the padded feature map
    # g_ref: (2, 2C)          permuted LayerNorm gamma (split by row parity)
    # b_ref: (2, 2C)          permuted LayerNorm beta
    # w_ref: (2, 2C, bn)      permuted reduction weight (split by row parity)
    # o_ref: (TR, W2, bn)
    xb = x_ref[...]
    xe = xb[:, 0].astype(jnp.float32)   # even rows: features [x0 | x2] along lanes
    xo = xb[:, 1].astype(jnp.float32)   # odd rows:  features [x1 | x3]
    c2 = xe.shape[-1]
    inv_c4 = 1.0 / (2 * c2)

    mu = (jnp.sum(xe, -1, keepdims=True) + jnp.sum(xo, -1, keepdims=True)) * inv_c4
    de = xe - mu
    do = xo - mu
    var = (jnp.sum(de * de, -1, keepdims=True)
           + jnp.sum(do * do, -1, keepdims=True)) * inv_c4
    inv = lax.rsqrt(var + 1e-5)                       # EUP slot

    gb = g_ref[...].astype(jnp.float32)
    bb = b_ref[...].astype(jnp.float32)
    ye = de * inv * gb[0:1, :] + bb[0:1, :]
    yo = do * inv * gb[1:2, :] + bb[1:2, :]

    tr, w2, _ = ye.shape
    wb = w_ref[...]
    ye2 = ye.reshape(tr * w2, c2).astype(wb.dtype)
    yo2 = yo.reshape(tr * w2, c2).astype(wb.dtype)
    acc = jnp.dot(ye2, wb[0], preferred_element_type=jnp.float32)
    acc = acc + jnp.dot(yo2, wb[1], preferred_element_type=jnp.float32)
    o_ref[...] = acc.reshape(tr, w2, acc.shape[-1]).astype(o_ref.dtype)


def _pick_row_tile(rows, w2, c4, itemsize):
    # ~2 MiB input block per pipeline buffer; keep TR a multiple of 8 when possible.
    per_row = max(1, w2 * c4 * itemsize)
    tr = max(1, (2 << 20) // per_row)
    tr = min(tr, rows)
    if tr >= 8:
        tr = (tr // 8) * 8
    return tr


def _pick_col_tile(n, c4, itemsize):
    if c4 * n * itemsize <= (4 << 20):     # whole weight block fits comfortably
        return n
    for c in (512, 256, 128):
        if n % c == 0:
            return c
    return n


# --------------------------------------- forward ---------------------------------------

def patch_merging(x, gamma, beta, w):
    """PatchMerging forward.

    Args:
      x:     (B, D, H, W, C)
      gamma: (4C,)  LayerNorm weight
      beta:  (4C,)  LayerNorm bias
      w:     (4C, 2C) reduction weight (transposed torch Linear weight)
    Returns:
      (B, D, ceil(H/2), ceil(W/2), 2C)
    """
    B, D, H, W, C = x.shape
    pad_h, pad_w = H % 2, W % 2
    if pad_h or pad_w:
        x = jnp.pad(x, ((0, 0), (0, 0), (0, pad_h), (0, pad_w), (0, 0)))
    H2, W2 = (H + pad_h) // 2, (W + pad_w) // 2
    N = w.shape[1]
    rows = B * D * H2

    # Free, contiguous view (no data movement): (rows, h_parity, W2, 2C).
    xv = x.reshape(rows, 2, W2, 2 * C)

    # Reorder params from torch's cat([x0,x1,x2,x3]) order (g = 2*w_off + h_off)
    # to the kernel's (h_off, w_off, c) feature order.  Tiny one-time ops.
    w3 = w.reshape(2, 2, C, N).transpose(1, 0, 2, 3).reshape(2, 2 * C, N)
    g2 = gamma.reshape(2, 2, C).transpose(1, 0, 2).reshape(2, 2 * C)
    b2 = beta.reshape(2, 2, C).transpose(1, 0, 2).reshape(2, 2 * C)

    tr = _pick_row_tile(rows, W2, 4 * C, x.dtype.itemsize)
    bn = _pick_col_tile(N, 4 * C, w.dtype.itemsize)

    out = pl.pallas_call(
        _patch_merging_kernel,
        out_shape=jax.ShapeDtypeStruct((rows, W2, N), x.dtype),
        grid=(pl.cdiv(rows, tr), pl.cdiv(N, bn)),
        in_specs=[
            pl.BlockSpec((tr, 2, W2, 2 * C), lambda i, j: (i, 0, 0, 0)),
            pl.BlockSpec((2, 2 * C), lambda i, j: (0, 0)),
            pl.BlockSpec((2, 2 * C), lambda i, j: (0, 0)),
            pl.BlockSpec((2, 2 * C, bn), lambda i, j: (0, 0, j)),
        ],
        out_specs=pl.BlockSpec((tr, W2, bn), lambda i, j: (i, 0, j)),
        compiler_params=pltpu.CompilerParams(
            dimension_semantics=("parallel", "parallel"),
            vmem_limit_bytes=32 * 1024 * 1024),
    )(xv, g2, b2, w3)

    return out.reshape(B, D, H2, W2, N)


class PatchMergingPallas:
    """Pallas implementation of PatchMerging (LayerNorm + Linear(4C->2C, bias=False))."""

    def __init__(self, key, dim, dtype=jnp.float32):
        self.dim = dim
        bound = 1.0 / math.sqrt(4 * dim)
        # torch Linear weight is (2C, 4C); we store its transpose (4C, 2C).
        self.w = jax.random.uniform(key, (4 * dim, 2 * dim), dtype, -bound, bound)
        self.gamma = jnp.ones((4 * dim,), dtype)
        self.beta = jnp.zeros((4 * dim,), dtype)

    def __call__(self, x):
        return patch_merging(x, self.gamma, self.beta, self.w)


# ------------------------------------ pure-JAX reference ------------------------------------

def _reference(x, gamma, beta, w):
    B, D, H, W, C = x.shape
    if H % 2 or W % 2:
        x = jnp.pad(x, ((0, 0), (0, 0), (0, H % 2), (0, W % 2), (0, 0)))
    x0 = x[:, :, 0::2, 0::2, :]
    x1 = x[:, :, 1::2, 0::2, :]
    x2 = x[:, :, 0::2, 1::2, :]
    x3 = x[:, :, 1::2, 1::2, :]
    xc = jnp.concatenate([x0, x1, x2, x3], axis=-1)
    mu = jnp.mean(xc, axis=-1, keepdims=True)
    var = jnp.mean((xc - mu) ** 2, axis=-1, keepdims=True)
    y = (xc - mu) / jnp.sqrt(var + 1e-5) * gamma + beta
    return y @ w


if __name__ == "__main__":
    key = jax.random.PRNGKey(0)
    B, C, D, H, W = 2, 4, 4, 8, 8          # small shapes; dim = C = 4

    k_param, k_x = jax.random.split(key)
    layer = PatchMergingPallas(k_param, dim=C)

    # Even spatial dims.
    x = jax.random.normal(k_x, (B, D, H, W, C), jnp.float32)
    out = layer(x)
    jax.block_until_ready(out)
    ref = _reference(x, layer.gamma, layer.beta, layer.w)
    assert out.shape == (B, D, H // 2, W // 2, 2 * C)
    assert bool(jnp.all(jnp.isfinite(out)))
    assert bool(jnp.allclose(out, ref, atol=2e-4, rtol=2e-4))

    # Odd spatial dims (exercises the padding path).
    x_odd = jax.random.normal(jax.random.PRNGKey(1), (B, D, 7, 5, C), jnp.float32)
    out_odd = layer(x_odd)
    jax.block_until_ready(out_odd)
    ref_odd = _reference(x_odd, layer.gamma, layer.beta, layer.w)
    assert out_odd.shape == (B, D, 4, 3, 2 * C)
    assert bool(jnp.allclose(out_odd, ref_odd, atol=2e-4, rtol=2e-4))

    print("KERNEL_OK")
</pallas_src>

<mosaic_0001>
module attributes {stable_mosaic.version = 11 : i64} {
  func.func @_patch_merging_kernel(%arg0: i32, %arg1: i32, %arg2: memref<32x2x4x8xf32, #tpu.memory_space<vmem>>, %arg3: memref<2x8xf32, #tpu.memory_space<vmem>>, %arg4: memref<2x8xf32, #tpu.memory_space<vmem>>, %arg5: memref<2x8x8xf32, #tpu.memory_space<vmem>>, %arg6: memref<32x4x8xf32, #tpu.memory_space<vmem>>) attributes {dimension_semantics = [#tpu.dimension_semantics<parallel>, #tpu.dimension_semantics<parallel>], iteration_bounds = array<i64: 1, 1>, scalar_prefetch = 0 : i64, scratch_operands = 0 : i64, tpu.core_type = #tpu.core_type<tc>, window_params = [{transform_indices = @transform_0, window_bounds = array<i64: 32, 2, 4, 8>}, {pipeline_mode = #tpu.pipeline_mode<synchronous>, transform_indices = @transform_1, window_bounds = array<i64: 2, 8>}, {pipeline_mode = #tpu.pipeline_mode<synchronous>, transform_indices = @transform_2, window_bounds = array<i64: 2, 8>}, {transform_indices = @transform_3, window_bounds = array<i64: 2, 8, 8>}, {transform_indices = @transform_4, window_bounds = array<i64: 32, 4, 8>}]} {
    %c0 = arith.constant 0 : index
    %c0_0 = arith.constant 0 : index
    %c0_1 = arith.constant 0 : index
    %c0_2 = arith.constant 0 : index
    %0 = vector.load %arg2[%c0, %c0_0, %c0_1, %c0_2] : memref<32x2x4x8xf32, #tpu.memory_space<vmem>>, vector<32x2x4x8xf32>
    %1 = vector.extract_strided_slice %0 {offsets = [0, 0, 0, 0], sizes = [32, 1, 4, 8], strides = [1, 1, 1, 1]} : vector<32x2x4x8xf32> to vector<32x1x4x8xf32>
    %2 = vector.shape_cast %1 : vector<32x1x4x8xf32> to vector<32x4x8xf32>
    %3 = vector.extract_strided_slice %0 {offsets = [0, 1, 0, 0], sizes = [32, 1, 4, 8], strides = [1, 1, 1, 1]} : vector<32x2x4x8xf32> to vector<32x1x4x8xf32>
    %4 = vector.shape_cast %3 : vector<32x1x4x8xf32> to vector<32x4x8xf32>
    %cst = arith.constant dense<0.000000e+00> : vector<32x4xf32>
    %5 = vector.multi_reduction <add>, %2, %cst [2] : vector<32x4x8xf32> to vector<32x4xf32>
    %6 = vector.shape_cast %5 : vector<32x4xf32> to vector<32x4x1xf32>
    %cst_3 = arith.constant dense<0.000000e+00> : vector<32x4xf32>
    %7 = vector.multi_reduction <add>, %4, %cst_3 [2] : vector<32x4x8xf32> to vector<32x4xf32>
    %8 = vector.shape_cast %7 : vector<32x4xf32> to vector<32x4x1xf32>
    %9 = arith.addf %6, %8 : vector<32x4x1xf32>
    %cst_4 = arith.constant 6.250000e-02 : f32
    %10 = vector.broadcast %cst_4 : f32 to vector<32x4x1xf32>
    %11 = arith.mulf %9, %10 : vector<32x4x1xf32>
    %12 = vector.broadcast %11 : vector<32x4x1xf32> to vector<32x4x8xf32>
    %13 = arith.subf %2, %12 : vector<32x4x8xf32>
    %14 = vector.broadcast %11 : vector<32x4x1xf32> to vector<32x4x8xf32>
    %15 = arith.subf %4, %14 : vector<32x4x8xf32>
    %16 = arith.mulf %13, %13 : vector<32x4x8xf32>
    %cst_5 = arith.constant dense<0.000000e+00> : vector<32x4xf32>
    %17 = vector.multi_reduction <add>, %16, %cst_5 [2] : vector<32x4x8xf32> to vector<32x4xf32>
    %18 = vector.shape_cast %17 : vector<32x4xf32> to vector<32x4x1xf32>
    %19 = arith.mulf %15, %15 : vector<32x4x8xf32>
    %cst_6 = arith.constant dense<0.000000e+00> : vector<32x4xf32>
    %20 = vector.multi_reduction <add>, %19, %cst_6 [2] : vector<32x4x8xf32> to vector<32x4xf32>
    %21 = vector.shape_cast %20 : vector<32x4xf32> to vector<32x4x1xf32>
    %22 = arith.addf %18, %21 : vector<32x4x1xf32>
    %cst_7 = arith.constant 6.250000e-02 : f32
    %23 = vector.broadcast %cst_7 : f32 to vector<32x4x1xf32>
    %24 = arith.mulf %22, %23 : vector<32x4x1xf32>
    %cst_8 = arith.constant 9.99999974E-6 : f32
    %25 = vector.broadcast %cst_8 : f32 to vector<32x4x1xf32>
    %26 = arith.addf %24, %25 : vector<32x4x1xf32>
    %27 = math.rsqrt %26 : vector<32x4x1xf32>
    %c0_9 = arith.constant 0 : index
    %c0_10 = arith.constant 0 : index
    %28 = vector.load %arg3[%c0_9, %c0_10] : memref<2x8xf32, #tpu.memory_space<vmem>>, vector<2x8xf32>
    %c0_11 = arith.constant 0 : index
    %c0_12 = arith.constant 0 : index
    %29 = vector.load %arg4[%c0_11, %c0_12] : memref<2x8xf32, #tpu.memory_space<vmem>>, vector<2x8xf32>
    %30 = vector.broadcast %27 : vector<32x4x1xf32> to vector<32x4x8xf32>
    %31 = arith.mulf %13, %30 : vector<32x4x8xf32>
    %32 = vector.extract_strided_slice %28 {offsets = [0, 0], sizes = [1, 8], strides = [1, 1]} : vector<2x8xf32> to vector<1x8xf32>
    %33 = vector.shape_cast %32 : vector<1x8xf32> to vector<1x1x8xf32>
    %34 = vector.broadcast %33 : vector<1x1x8xf32> to vector<32x4x8xf32>
    %35 = arith.mulf %31, %34 : vector<32x4x8xf32>
    %36 = vector.extract_strided_slice %29 {offsets = [0, 0], sizes = [1, 8], strides = [1, 1]} : vector<2x8xf32> to vector<1x8xf32>
    %37 = vector.shape_cast %36 : vector<1x8xf32> to vector<1x1x8xf32>
    %38 = vector.broadcast %37 : vector<1x1x8xf32> to vector<32x4x8xf32>
    %39 = arith.addf %35, %38 : vector<32x4x8xf32>
    %40 = vector.broadcast %27 : vector<32x4x1xf32> to vector<32x4x8xf32>
    %41 = arith.mulf %15, %40 : vector<32x4x8xf32>
    %42 = vector.extract_strided_slice %28 {offsets = [1, 0], sizes = [1, 8], strides = [1, 1]} : vector<2x8xf32> to vector<1x8xf32>
    %43 = vector.shape_cast %42 : vector<1x8xf32> to vector<1x1x8xf32>
    %44 = vector.broadcast %43 : vector<1x1x8xf32> to vector<32x4x8xf32>
    %45 = arith.mulf %41, %44 : vector<32x4x8xf32>
    %46 = vector.extract_strided_slice %29 {offsets = [1, 0], sizes = [1, 8], strides = [1, 1]} : vector<2x8xf32> to vector<1x8xf32>
    %47 = vector.shape_cast %46 : vector<1x8xf32> to vector<1x1x8xf32>
    %48 = vector.broadcast %47 : vector<1x1x8xf32> to vector<32x4x8xf32>
    %49 = arith.addf %45, %48 : vector<32x4x8xf32>
    %c0_13 = arith.constant 0 : index
    %c0_14 = arith.constant 0 : index
    %c0_15 = arith.constant 0 : index
    %50 = vector.load %arg5[%c0_13, %c0_14, %c0_15] : memref<2x8x8xf32, #tpu.memory_space<vmem>>, vector<2x8x8xf32>
    %51 = vector.shape_cast %39 : vector<32x4x8xf32> to vector<128x8xf32>
    %52 = vector.shape_cast %49 : vector<32x4x8xf32> to vector<128x8xf32>
    %53 = vector.extract_strided_slice %50 {offsets = [0, 0, 0], sizes = [1, 8, 8], strides = [1, 1, 1]} : vector<2x8x8xf32> to vector<1x8x8xf32>
    %54 = vector.shape_cast %53 : vector<1x8x8xf32> to vector<8x8xf32>
    %cst_16 = arith.constant dense<0.000000e+00> : vector<128x8xf32>
    %55 = tpu.matmul %51, %54, %cst_16 {dimension_numbers = #tpu.dot_dimension_numbers<[1], [0], [0], [1], [0, 0, 1, 1], [], []>} : vector<128x8xf32>, vector<8x8xf32>, vector<128x8xf32> -> vector<128x8xf32>
    %56 = vector.extract_strided_slice %50 {offsets = [1, 0, 0], sizes = [1, 8, 8], strides = [1, 1, 1]} : vector<2x8x8xf32> to vector<1x8x8xf32>
    %57 = vector.shape_cast %56 : vector<1x8x8xf32> to vector<8x8xf32>
    %cst_17 = arith.constant dense<0.000000e+00> : vector<128x8xf32>
    %58 = tpu.matmul %52, %57, %cst_17 {dimension_numbers = #tpu.dot_dimension_numbers<[1], [0], [0], [1], [0, 0, 1, 1], [], []>} : vector<128x8xf32>, vector<8x8xf32>, vector<128x8xf32> -> vector<128x8xf32>
    %59 = arith.addf %55, %58 : vector<128x8xf32>
    %60 = vector.shape_cast %59 : vector<128x8xf32> to vector<32x4x8xf32>
    %c0_18 = arith.constant 0 : index
    %c0_19 = arith.constant 0 : index
    %c0_20 = arith.constant 0 : index
    %61 = vector.load %arg6[%c0_18, %c0_19, %c0_20] : memref<32x4x8xf32, #tpu.memory_space<vmem>>, vector<32x4x8xf32>
    tpu.vector_store %arg6[%c0_18, %c0_19, %c0_20], %60 {strides = array<i32>} : memref<32x4x8xf32, #tpu.memory_space<vmem>>, vector<32x4x8xf32>,
    return
  }
  func.func @transform_0(%arg0: i32, %arg1: i32) -> (i32, i32, i32, i32) {
    %c0_i32 = arith.constant 0 : i32
    %c0_i32_0 = arith.constant 0 : i32
    %c0_i32_1 = arith.constant 0 : i32
    %c0_i32_2 = arith.constant 0 : i32
    return %arg0, %c0_i32, %c0_i32_0, %c0_i32_1 : i32, i32, i32, i32
  }
  func.func @transform_1(%arg0: i32, %arg1: i32) -> (i32, i32) {
    %c0_i32 = arith.constant 0 : i32
    %c0_i32_0 = arith.constant 0 : i32
    %c0_i32_1 = arith.constant 0 : i32
    return %c0_i32, %c0_i32_0 : i32, i32
  }
  func.func @transform_2(%arg0: i32, %arg1: i32) -> (i32, i32) {
    %c0_i32 = arith.constant 0 : i32
    %c0_i32_0 = arith.constant 0 : i32
    %c0_i32_1 = arith.constant 0 : i32
    return %c0_i32, %c0_i32_0 : i32, i32
  }
  func.func @transform_3(%arg0: i32, %arg1: i32) -> (i32, i32, i32) {
    %c0_i32 = arith.constant 0 : i32
    %c0_i32_0 = arith.constant 0 : i32
    %c0_i32_1 = arith.constant 0 : i32
    return %c0_i32, %c0_i32_0, %arg1 : i32, i32, i32
  }
  func.func @transform_4(%arg0: i32, %arg1: i32) -> (i32, i32, i32) {
    %c0_i32 = arith.constant 0 : i32
    %c0_i32_0 = arith.constant 0 : i32
    return %arg0, %c0_i32, %arg1 : i32, i32, i32
  }
}

</mosaic_0001>

<bundles_post_ra>
// kernel: tpu_custom_call.1
= control target key start
LH: loop header
LB: loop body
LE: loop exit
PB: predicated region body
PF: predicated region fallthrough
CT: control target
= control target key end

     0   :  { %vm81_vm0 = vcmask 60416   ;;  %vm1046_vm1 = vcmask 64512   ;;  %s2944_s0 = inlined_call_operand.vmem [shape: f32[32,2,4,8], index: 0, kind: input, shape index: {}]   ;;  %s2945_s3 = inlined_call_operand.vmem [shape: f32[2,8,8], index: 3, kind: input, shape index: {}]   ;;  %s2946_s1 = inlined_call_operand.vmem [shape: f32[2,8], index: 1, kind: input, shape index: {}]   ;;  %s2947_s2 = inlined_call_operand.vmem [shape: f32[2,8], index: 2, kind: input, shape index: {}]   ;;  %s2948_s4 = inlined_call_operand.vmem [shape: f32[32,4,8], index: 4, kind: output, shape index: {}]  }
   0x1   :  { %v1743_v0 = vld [vmem:[%s2944_s0 + $0x4] sm:$0xf]  ;;  %v1748_v1 = vld [vmem:[%s2944_s0] sm:$0xf]  ;;  %v1753_v2 = vld [vmem:[%s2944_s0 + $0xc] sm:$0xf] }
   0x2   :  { %v178_v3 = vsel %vm81_vm0, %v1743_v0, 0.0  ;;  %v82_v4 = vsel %vm81_vm0, %v1748_v1, 0.0  ;;  %v1762_v5 = vld [vmem:[%s2944_s0 + $0x8] sm:$0xf]  ;;  %v181_v6 = vsel %vm81_vm0, %v1753_v2, 0.0 }
   0x3   :  { %179 = vadd.xlane.f32.xlu1 %v178_v3  ;;  %83 = vadd.xlane.f32.xlu0 %v82_v4  ;;  %v85_v7 = vsel %vm81_vm0, %v1762_v5, 0.0  ;;  %v1771_v8 = vld [vmem:[%s2944_s0 + $0x18] sm:$0xf]  ;;  %v1776_v9 = vld [vmem:[%s2944_s0 + $0x10] sm:$0xf] }
   0x4   :  { %v91_v10 = vsel %vm81_vm0, %v1771_v8, 0.0  ;;  %v88_v11 = vsel %vm81_vm0, %v1776_v9, 0.0  ;;  %v1785_v12 = vld [vmem:[%s2944_s0 + $0x1c] sm:$0xf]  ;;  %v1790_v13 = vld [vmem:[%s2944_s0 + $0x14] sm:$0xf] }
   0x5   :  { %v187_v14 = vsel %vm81_vm0, %v1785_v12, 0.0  ;;  %v184_v15 = vsel %vm81_vm0, %v1790_v13, 0.0  ;;  %v1799_v16 = vld [vmem:[%s2944_s0 + $0x28] sm:$0xf]  ;;  %v1804_v17 = vld [vmem:[%s2944_s0 + $0x20] sm:$0xf] }
   0x6   :  { %v97_v18 = vsel %vm81_vm0, %v1799_v16, 0.0  ;;  %v94_v19 = vsel %vm81_vm0, %v1804_v17, 0.0  ;;  %v1813_v20 = vld [vmem:[%s2944_s0 + $0x2c] sm:$0xf]  ;;  %v1818_v21 = vld [vmem:[%s2944_s0 + $0x24] sm:$0xf] }
   0x7   :  { %182 = vadd.xlane.f32.xlu1 %v181_v6  ;;  %86 = vadd.xlane.f32.xlu0 %v85_v7  ;;  %v193_v22 = vsel %vm81_vm0, %v1813_v20, 0.0  ;;  %v190_v23 = vsel %vm81_vm0, %v1818_v21, 0.0  ;;  %v1827_v24 = vld [vmem:[%s2944_s0 + $0x38] sm:$0xf]  ;;  %v1832_v25 = vld [vmem:[%s2944_s0 + $0x30] sm:$0xf] }
   0x8   :  { %v103_v26 = vsel %vm81_vm0, %v1827_v24, 0.0  ;;  %v100_v27 = vsel %vm81_vm0, %v1832_v25, 0.0  ;;  %v1841_v28 = vld [vmem:[%s2944_s0 + $0x3c] sm:$0xf]  ;;  %v1846_v29 = vld [vmem:[%s2944_s0 + $0x34] sm:$0xf] }
   0x9   :  { %v199_v30 = vsel %vm81_vm0, %v1841_v28, 0.0  ;;  %v196_v31 = vsel %vm81_vm0, %v1846_v29, 0.0  ;;  %v1855_v32 = vld [vmem:[%s2944_s0 + $0x48] sm:$0xf]  ;;  %v1860_v33 = vld [vmem:[%s2944_s0 + $0x40] sm:$0xf] }
   0xa   :  { %v109_v34 = vsel %vm81_vm0, %v1855_v32, 0.0  ;;  %v106_v35 = vsel %vm81_vm0, %v1860_v33, 0.0  ;;  %v1869_v36 = vld [vmem:[%s2944_s0 + $0x4c] sm:$0xf]  ;;  %v1874_v37 = vld [vmem:[%s2944_s0 + $0x44] sm:$0xf] }
   0xb   :  { %92 = vadd.xlane.f32.xlu1 %v91_v10  ;;  %89 = vadd.xlane.f32.xlu0 %v88_v11  ;;  %v205_v38 = vsel %vm81_vm0, %v1869_v36, 0.0  ;;  %v202_v39 = vsel %vm81_vm0, %v1874_v37, 0.0  ;;  %v1883_v40 = vld [vmem:[%s2944_s0 + $0x58] sm:$0xf]  ;;  %v1888_v41 = vld [vmem:[%s2944_s0 + $0x50] sm:$0xf] }
   0xc   :  { %v115_v42 = vsel %vm81_vm0, %v1883_v40, 0.0  ;;  %v112_v43 = vsel %vm81_vm0, %v1888_v41, 0.0  ;;  %v1897_v44 = vld [vmem:[%s2944_s0 + $0x5c] sm:$0xf]  ;;  %v1902_v45 = vld [vmem:[%s2944_s0 + $0x54] sm:$0xf] }
   0xd   :  { %v211_v46 = vsel %vm81_vm0, %v1897_v44, 0.0  ;;  %v208_v47 = vsel %vm81_vm0, %v1902_v45, 0.0  ;;  %v1911_v48 = vld [vmem:[%s2944_s0 + $0x68] sm:$0xf]  ;;  %v1916_v49 = vld [vmem:[%s2944_s0 + $0x60] sm:$0xf] }
   0xe   :  { %v121_v50 = vsel %vm81_vm0, %v1911_v48, 0.0  ;;  %v118_v51 = vsel %vm81_vm0, %v1916_v49, 0.0  ;;  %v1925_v52 = vld [vmem:[%s2944_s0 + $0x6c] sm:$0xf]  ;;  %v1930_v53 = vld [vmem:[%s2944_s0 + $0x64] sm:$0xf] }
   0xf   :  { %188 = vadd.xlane.f32.xlu1 %v187_v14  ;;  %185 = vadd.xlane.f32.xlu0 %v184_v15  ;;  %v217_v54 = vsel %vm81_vm0, %v1925_v52, 0.0  ;;  %v214_v55 = vsel %vm81_vm0, %v1930_v53, 0.0  ;;  %v1939_v56 = vld [vmem:[%s2944_s0 + $0x78] sm:$0xf]  ;;  %v1944_v57 = vld [vmem:[%s2944_s0 + $0x70] sm:$0xf] }
  0x10   :  { %v127_v58 = vsel %vm81_vm0, %v1939_v56, 0.0  ;;  %v124_v59 = vsel %vm81_vm0, %v1944_v57, 0.0  ;;  %v1953_v60 = vld [vmem:[%s2944_s0 + $0x7c] sm:$0xf]  ;;  %v1958_v61 = vld [vmem:[%s2944_s0 + $0x74] sm:$0xf] }
  0x11   :  { %v223_v62 = vsel %vm81_vm0, %v1953_v60, 0.0  ;;  %v220_v63 = vsel %vm81_vm0, %v1958_v61, 0.0  ;;  %v1967_v3 = vld [vmem:[%s2944_s0 + $0x88] sm:$0xf]  ;;  %v1972_v4 = vld [vmem:[%s2944_s0 + $0x80] sm:$0xf] }
  0x12   :  { %v133_v6 = vsel %vm81_vm0, %v1967_v3, 0.0  ;;  %v130_v7 = vsel %vm81_vm0, %v1972_v4, 0.0  ;;  %v1981_v10 = vld [vmem:[%s2944_s0 + $0x8c] sm:$0xf]  ;;  %v1986_v11 = vld [vmem:[%s2944_s0 + $0x84] sm:$0xf] }
  0x13   :  { %98 = vadd.xlane.f32.xlu1 %v97_v18  ;;  %95 = vadd.xlane.f32.xlu0 %v94_v19  ;;  %v229_v14 = vsel %vm81_vm0, %v1981_v10, 0.0  ;;  %v226_v15 = vsel %vm81_vm0, %v1986_v11, 0.0  ;;  %v1995_v18 = vld [vmem:[%s2944_s0 + $0x98] sm:$0xf]  ;;  %v2000_v19 = vld [vmem:[%s2944_s0 + $0x90] sm:$0xf] }
  0x17   :  { %194 = vadd.xlane.f32.xlu1 %v193_v22  ;;  %191 = vadd.xlane.f32.xlu0 %v190_v23  ;;  %v139_v22 = vsel %vm81_vm0, %v1995_v18, 0.0  ;;  %v136_v23 = vsel %vm81_vm0, %v2000_v19, 0.0 }
  0x1b   :  { %104 = vadd.xlane.f32.xlu1 %v103_v26  ;;  %101 = vadd.xlane.f32.xlu0 %v100_v27  ;;  %v2009_v26 = vld [vmem:[%s2944_s0 + $0x9c] sm:$0xf]  ;;  %v2014_v27 = vld [vmem:[%s2944_s0 + $0x94] sm:$0xf] }
  0x1f   :  { %200 = vadd.xlane.f32.xlu1 %v199_v30  ;;  %197 = vadd.xlane.f32.xlu0 %v196_v31  ;;  %v235_v30 = vsel %vm81_vm0, %v2009_v26, 0.0  ;;  %v232_v31 = vsel %vm81_vm0, %v2014_v27, 0.0 }
  0x23   :  { %110 = vadd.xlane.f32.xlu1 %v109_v34  ;;  %107 = vadd.xlane.f32.xlu0 %v106_v35  ;;  %v2023_v34 = vld [vmem:[%s2944_s0 + $0xa8] sm:$0xf]  ;;  %v2028_v35 = vld [vmem:[%s2944_s0 + $0xa0] sm:$0xf] }
  0x27   :  { %206 = vadd.xlane.f32.xlu1 %v205_v38  ;;  %203 = vadd.xlane.f32.xlu0 %v202_v39  ;;  %v145_v38 = vsel %vm81_vm0, %v2023_v34, 0.0  ;;  %v142_v39 = vsel %vm81_vm0, %v2028_v35, 0.0 }
  0x2b   :  { %116 = vadd.xlane.f32.xlu1 %v115_v42  ;;  %113 = vadd.xlane.f32.xlu0 %v112_v43  ;;  %v2037_v42 = vld [vmem:[%s2944_s0 + $0xac] sm:$0xf]  ;;  %v2042_v43 = vld [vmem:[%s2944_s0 + $0xa4] sm:$0xf] }
  0x2f   :  { %212 = vadd.xlane.f32.xlu1 %v211_v46  ;;  %209 = vadd.xlane.f32.xlu0 %v208_v47  ;;  %v241_v46 = vsel %vm81_vm0, %v2037_v42, 0.0  ;;  %v238_v47 = vsel %vm81_vm0, %v2042_v43, 0.0 }
  0x33   :  { %122 = vadd.xlane.f32.xlu1 %v121_v50  ;;  %119 = vadd.xlane.f32.xlu0 %v118_v51  ;;  %v2051_v50 = vld [vmem:[%s2944_s0 + $0xb8] sm:$0xf]  ;;  %v2056_v51 = vld [vmem:[%s2944_s0 + $0xb0] sm:$0xf] }
  0x37   :  { %218 = vadd.xlane.f32.xlu1 %v217_v54  ;;  %215 = vadd.xlane.f32.xlu0 %v214_v55  ;;  %v151_v54 = vsel %vm81_vm0, %v2051_v50, 0.0  ;;  %v148_v55 = vsel %vm81_vm0, %v2056_v51, 0.0 }
  0x3b   :  { %128 = vadd.xlane.f32.xlu1 %v127_v58  ;;  %125 = vadd.xlane.f32.xlu0 %v124_v59  ;;  %v2065_v58 = vld [vmem:[%s2944_s0 + $0xbc] sm:$0xf]  ;;  %v2070_v59 = vld [vmem:[%s2944_s0 + $0xb4] sm:$0xf] }
  0x3f   :  { %224 = vadd.xlane.f32.xlu1 %v223_v62  ;;  %221 = vadd.xlane.f32.xlu0 %v220_v63  ;;  %v247_v62 = vsel %vm81_vm0, %v2065_v58, 0.0  ;;  %v244_v63 = vsel %vm81_vm0, %v2070_v59, 0.0 }
  0x43   :  { %134 = vadd.xlane.f32.xlu1 %v133_v6  ;;  %131 = vadd.xlane.f32.xlu0 %v130_v7  ;;  %v2079_v6 = vld [vmem:[%s2944_s0 + $0xc8] sm:$0xf]  ;;  %v2084_v7 = vld [vmem:[%s2944_s0 + $0xc0] sm:$0xf] }
  0x44   :  { %2990 = vst [vmem:[#allocation2_spill] sm:$0xff] %v2084_v7 }
  0x47   :  { %230 = vadd.xlane.f32.xlu1 %v229_v14  ;;  %227 = vadd.xlane.f32.xlu0 %v226_v15  ;;  %v157_v14 = vsel %vm81_vm0, %v2079_v6, 0.0  ;;  %v154_v15 = vsel %vm81_vm0, %v2084_v7, 0.0 }
  0x4b   :  { %140 = vadd.xlane.f32.xlu1 %v139_v22  ;;  %137 = vadd.xlane.f32.xlu0 %v136_v23  ;;  %v2093_v22 = vld [vmem:[%s2944_s0 + $0xcc] sm:$0xf]  ;;  %v2098_v23 = vld [vmem:[%s2944_s0 + $0xc4] sm:$0xf] }
  0x4c   :  { %2991 = vst [vmem:[#allocation3_spill] sm:$0xff] %v2093_v22  ;;  %2992 = vst [vmem:[#allocation4_spill] sm:$0xff] %v2098_v23 }
  0x4f   :  { %236 = vadd.xlane.f32.xlu1 %v235_v30  ;;  %233 = vadd.xlane.f32.xlu0 %v232_v31  ;;  %v253_v30 = vsel %vm81_vm0, %v2093_v22, 0.0  ;;  %v250_v31 = vsel %vm81_vm0, %v2098_v23, 0.0 }
  0x53   :  { %146 = vadd.xlane.f32.xlu1 %v145_v38  ;;  %143 = vadd.xlane.f32.xlu0 %v142_v39  ;;  %v2107_v38 = vld [vmem:[%s2944_s0 + $0xd8] sm:$0xf]  ;;  %v2112_v39 = vld [vmem:[%s2944_s0 + $0xd0] sm:$0xf] }
  0x54   :  { %2993 = vst [vmem:[#allocation5_spill] sm:$0xff] %v2107_v38  ;;  %2994 = vst [vmem:[#allocation6_spill] sm:$0xff] %v2112_v39 }
  0x57   :  { %242 = vadd.xlane.f32.xlu1 %v241_v46  ;;  %239 = vadd.xlane.f32.xlu0 %v238_v47  ;;  %v163_v46 = vsel %vm81_vm0, %v2107_v38, 0.0  ;;  %v160_v47 = vsel %vm81_vm0, %v2112_v39, 0.0 }
  0x5b   :  { %152 = vadd.xlane.f32.xlu1 %v151_v54  ;;  %149 = vadd.xlane.f32.xlu0 %v148_v55  ;;  %v2121_v54 = vld [vmem:[%s2944_s0 + $0xdc] sm:$0xf]  ;;  %v2126_v55 = vld [vmem:[%s2944_s0 + $0xd4] sm:$0xf] }
  0x5c   :  { %2995 = vst [vmem:[#allocation7_spill] sm:$0xff] %v2121_v54  ;;  %2996 = vst [vmem:[#allocation8_spill] sm:$0xff] %v2126_v55 }
  0x5f   :  { %248 = vadd.xlane.f32.xlu1 %v247_v62  ;;  %245 = vadd.xlane.f32.xlu0 %v244_v63  ;;  %v259_v62 = vsel %vm81_vm0, %v2121_v54, 0.0  ;;  %v256_v63 = vsel %vm81_vm0, %v2126_v55, 0.0 }
  0x63   :  { %158 = vadd.xlane.f32.xlu1 %v157_v14  ;;  %155 = vadd.xlane.f32.xlu0 %v154_v15  ;;  %v2135_v14 = vld [vmem:[%s2944_s0 + $0xe8] sm:$0xf]  ;;  %v2140_v15 = vld [vmem:[%s2944_s0 + $0xe0] sm:$0xf] }
  0x64   :  { %2997 = vst [vmem:[#allocation9_spill] sm:$0xff] %v2135_v14  ;;  %2998 = vst [vmem:[#allocation10_spill] sm:$0xff] %v2140_v15 }
  0x67   :  { %254 = vadd.xlane.f32.xlu1 %v253_v30  ;;  %251 = vadd.xlane.f32.xlu0 %v250_v31  ;;  %v169_v30 = vsel %vm81_vm0, %v2135_v14, 0.0  ;;  %v166_v31 = vsel %vm81_vm0, %v2140_v15, 0.0  ;;  %v2163_v15 = vld [vmem:[%s2944_s0 + $0xf8] sm:$0xf]  ;;  %v2168_v14 = vld [vmem:[%s2944_s0 + $0xf0] sm:$0xf] }
  0x68   :  { %3001 = vst [vmem:[#allocation13_spill] sm:$0xff] %v2163_v15  ;;  %3002 = vst [vmem:[#allocation14_spill] sm:$0xff] %v2168_v14 }
  0x6b   :  { %164 = vadd.xlane.f32.xlu1 %v163_v46  ;;  %161 = vadd.xlane.f32.xlu0 %v160_v47  ;;  %v2149_v46 = vld [vmem:[%s2944_s0 + $0xec] sm:$0xf]  ;;  %v2154_v47 = vld [vmem:[%s2944_s0 + $0xe4] sm:$0xf] }
  0x6c   :  { %2999 = vst [vmem:[#allocation11_spill] sm:$0xff] %v2149_v46  ;;  %3000 = vst [vmem:[#allocation12_spill] sm:$0xff] %v2154_v47 }
  0x6f   :  { %260 = vadd.xlane.f32.xlu1 %v259_v62  ;;  %257 = vadd.xlane.f32.xlu0 %v256_v63  ;;  %v265_v62 = vsel %vm81_vm0, %v2149_v46, 0.0  ;;  %v262_v63 = vsel %vm81_vm0, %v2154_v47, 0.0  ;;  %v2177_v47 = vld [vmem:[%s2944_s0 + $0xfc] sm:$0xf]  ;;  %v2182_v46 = vld [vmem:[%s2944_s0 + $0xf4] sm:$0xf] }
  0x70   :  { %3003 = vst [vmem:[#allocation15_spill] sm:$0xff] %v2177_v47  ;;  %3004 = vst [vmem:[#allocation16_spill] sm:$0xff] %v2182_v46 }
  0x73   :  { %170 = vadd.xlane.f32.xlu1 %v169_v30  ;;  %167 = vadd.xlane.f32.xlu0 %v166_v31  ;;  %v175_v30 = vsel %vm81_vm0, %v2163_v15, 0.0  ;;  %v172_v31 = vsel %vm81_vm0, %v2168_v14, 0.0 }
  0x77   :  { %266 = vadd.xlane.f32.xlu1 %v265_v62  ;;  %263 = vadd.xlane.f32.xlu0 %v262_v63  ;;  %v271_v62 = vsel %vm81_vm0, %v2177_v47, 0.0  ;;  %v268_v63 = vsel %vm81_vm0, %v2182_v46, 0.0 }
  0x7b   :  { %176 = vadd.xlane.f32.xlu1 %v175_v30  ;;  %173 = vadd.xlane.f32.xlu0 %v172_v31 }
  0x7f   :  { %272 = vadd.xlane.f32.xlu1 %v271_v62  ;;  %269 = vadd.xlane.f32.xlu0 %v268_v63 }
  0x8c   :  { %v180_v14 = vpop.xlane.xlu1 %179  ;;  %v84_v15 = vpop.xlane.xlu0 %83 }
  0x8d   :  { %v274_v55 = vadd.f32 %v180_v14, %v84_v15 }
  0x8f   :  { %v306_v39 = vmul.f32 0.0625, %v274_v55 }
  0x90   :  { %v183_v54 = vpop.xlane.xlu1 %182  ;;  %v87_v38 = vpop.xlane.xlu0 %86 }
  0x91   :  { %v2189_v23 = vsub.f32 %v1748_v1, %v306_v39  ;;  %v2192_v30 = vsub.f32 %v1743_v0, %v306_v39  ;;  %v275_v31 = vadd.f32 %v183_v54, %v87_v38 }
  0x93   :  { %3005 = vst [vmem:[#allocation17_spill] sm:$0xff] %v2189_v23  ;;  %3006 = vst [vmem:[#allocation18_spill] sm:$0xff] %v2192_v30  ;;  %v307_v7 = vmul.f32 0.0625, %v275_v31  ;;  %v402_v47 = vmul.f32 %v2189_v23, %v2189_v23  ;;  %v530_v1 = vmul.f32 %v2192_v30, %v2192_v30 }
  0x94   :  { %v93_v46 = vpop.xlane.xlu1 %92  ;;  %v90_v62 = vpop.xlane.xlu0 %89 }
  0x95   :  { %v2197_v63 = vsub.f32 %v1762_v5, %v307_v7  ;;  %v2200_v55 = vsub.f32 %v1753_v2, %v307_v7  ;;  %v434_v14 = vsel %vm81_vm0, %v402_v47, 0.0  ;;  %v562_v31 = vsel %vm81_vm0, %v530_v1, 0.0 }
  0x96   :  { %435 = vadd.xlane.f32.xlu0 %v434_v14 }
  0x97   :  { %3007 = vst [vmem:[#allocation19_spill] sm:$0xff] %v2197_v63  ;;  %v403_v0 = vmul.f32 %v2197_v63, %v2197_v63  ;;  %v531_v54 = vmul.f32 %v2200_v55, %v2200_v55 }
  0x98   :  { %v189_v38 = vpop.xlane.xlu1 %188  ;;  %v186_v39 = vpop.xlane.xlu0 %185 }
  0x99   :  { %v277_v15 = vadd.f32 %v189_v38, %v93_v46  ;;  %v276_v5 = vadd.f32 %v186_v39, %v90_v62  ;;  %v437_v2 = vsel %vm81_vm0, %v403_v0, 0.0  ;;  %v565_v30 = vsel %vm81_vm0, %v531_v54, 0.0 }
  0x9a   :  { %563 = vadd.xlane.f32.xlu0 %v562_v31  ;;  %438 = vadd.xlane.f32.xlu1 %v437_v2 }
  0x9b   :  { %v309_v7 = vmul.f32 0.0625, %v277_v15  ;;  %v308_v47 = vmul.f32 0.0625, %v276_v5 }
  0x9c   :  { %v99_v23 = vpop.xlane.xlu1 %98  ;;  %v96_v14 = vpop.xlane.xlu0 %95 }
  0x9d   :  { %v2213_v63 = vsub.f32 %v1771_v8, %v309_v7  ;;  %v2216_v22 = vsub.f32 %v1785_v12, %v309_v7  ;;  %v2219_v46 = vsub.f32 %v1776_v9, %v308_v47  ;;  %v2222_v62 = vsub.f32 %v1790_v13, %v308_v47 }
  0x9e   :  { %566 = vadd.xlane.f32.xlu1 %v565_v30 }
  0x9f   :  { %3008 = vst [vmem:[#allocation20_spill] sm:$0xff] %v2219_v46  ;;  %v405_v1 = vmul.f32 %v2213_v63, %v2213_v63  ;;  %v404_v0 = vmul.f32 %v2219_v46, %v2219_v46  ;;  %v533_v8 = vmul.f32 %v2216_v22, %v2216_v22  ;;  %v532_v12 = vmul.f32 %v2222_v62, %v2222_v62 }
  0xa0   :  { %v195_v38 = vpop.xlane.xlu1 %194  ;;  %v192_v39 = vpop.xlane.xlu0 %191 }
  0xa1   :  { %v279_v9 = vadd.f32 %v195_v38, %v99_v23  ;;  %v278_v54 = vadd.f32 %v192_v39, %v96_v14  ;;  %v443_v13 = vsel %vm81_vm0, %v405_v1, 0.0  ;;  %v440_v30 = vsel %vm81_vm0, %v404_v0, 0.0 }
  0xa2   :  { %444 = vadd.xlane.f32.xlu1 %v443_v13  ;;  %441 = vadd.xlane.f32.xlu0 %v440_v30  ;;  %v571_v7 = vsel %vm81_vm0, %v533_v8, 0.0  ;;  %v568_v47 = vsel %vm81_vm0, %v532_v12, 0.0 }
  0xa3   :  { %v311_v15 = vmul.f32 0.0625, %v279_v9  ;;  %v310_v5 = vmul.f32 0.0625, %v278_v54 }
  0xa4   :  { %v105_v31 = vpop.xlane.xlu1 %104  ;;  %v102_v2 = vpop.xlane.xlu0 %101 }
  0xa5   :  { %v2237_v46 = vsub.f32 %v1799_v16, %v311_v15  ;;  %v2240_v23 = vsub.f32 %v1813_v20, %v311_v15  ;;  %v2243_v14 = vsub.f32 %v1804_v17, %v310_v5  ;;  %v2246_v1 = vsub.f32 %v1818_v21, %v310_v5 }
  0xa6   :  { %572 = vadd.xlane.f32.xlu1 %v571_v7  ;;  %569 = vadd.xlane.f32.xlu0 %v568_v47 }
  0xa7   :  { %v407_v0 = vmul.f32 %v2237_v46, %v2237_v46  ;;  %v406_v38 = vmul.f32 %v2243_v14, %v2243_v14  ;;  %v535_v20 = vmul.f32 %v2240_v23, %v2240_v23  ;;  %v534_v17 = vmul.f32 %v2246_v1, %v2246_v1 }
  0xa8   :  { %v201_v39 = vpop.xlane.xlu1 %200  ;;  %v198_v16 = vpop.xlane.xlu0 %197 }
  0xa9   :  { %v281_v8 = vadd.f32 %v201_v39, %v105_v31  ;;  %v280_v12 = vadd.f32 %v198_v16, %v102_v2  ;;  %v449_v21 = vsel %vm81_vm0, %v407_v0, 0.0  ;;  %v446_v9 = vsel %vm81_vm0, %v406_v38, 0.0 }
  0xaa   :  { %450 = vadd.xlane.f32.xlu1 %v449_v21  ;;  %447 = vadd.xlane.f32.xlu0 %v446_v9  ;;  %v577_v5 = vsel %vm81_vm0, %v535_v20, 0.0  ;;  %v574_v7 = vsel %vm81_vm0, %v534_v17, 0.0 }
  0xab   :  { %v313_v54 = vmul.f32 0.0625, %v281_v8  ;;  %v312_v13 = vmul.f32 0.0625, %v280_v12 }
  0xac   :  { %v111_v30 = vpop.xlane.xlu1 %110  ;;  %v108_v15 = vpop.xlane.xlu0 %107 }
  0xad   :  { %v2261_v47 = vsub.f32 %v1827_v24, %v313_v54  ;;  %v2264_v31 = vsub.f32 %v1841_v28, %v313_v54  ;;  %v2267_v2 = vsub.f32 %v1832_v25, %v312_v13  ;;  %v2270_v0 = vsub.f32 %v1846_v29, %v312_v13 }
  0xae   :  { %578 = vadd.xlane.f32.xlu1 %v577_v5  ;;  %575 = vadd.xlane.f32.xlu0 %v574_v7 }
  0xaf   :  { %v409_v38 = vmul.f32 %v2261_v47, %v2261_v47  ;;  %v408_v39 = vmul.f32 %v2267_v2, %v2267_v2  ;;  %v537_v28 = vmul.f32 %v2264_v31, %v2264_v31  ;;  %v536_v25 = vmul.f32 %v2270_v0, %v2270_v0 }
  0xb0   :  { %v207_v16 = vpop.xlane.xlu1 %206  ;;  %v204_v24 = vpop.xlane.xlu0 %203 }
  0xb1   :  { %v283_v20 = vadd.f32 %v207_v16, %v111_v30  ;;  %v282_v17 = vadd.f32 %v204_v24, %v108_v15  ;;  %v455_v29 = vsel %vm81_vm0, %v409_v38, 0.0  ;;  %v452_v8 = vsel %vm81_vm0, %v408_v39, 0.0 }
  0xb2   :  { %456 = vadd.xlane.f32.xlu1 %v455_v29  ;;  %453 = vadd.xlane.f32.xlu0 %v452_v8  ;;  %v583_v13 = vsel %vm81_vm0, %v537_v28, 0.0  ;;  %v580_v5 = vsel %vm81_vm0, %v536_v25, 0.0 }
  0xb3   :  { %v315_v12 = vmul.f32 0.0625, %v283_v20  ;;  %v314_v21 = vmul.f32 0.0625, %v282_v17 }
  0xb4   :  { %v117_v9 = vpop.xlane.xlu1 %116  ;;  %v114_v54 = vpop.xlane.xlu0 %113 }
  0xb5   :  { %v2285_v7 = vsub.f32 %v1855_v32, %v315_v12  ;;  %v2288_v30 = vsub.f32 %v1869_v36, %v315_v12  ;;  %v2291_v15 = vsub.f32 %v1860_v33, %v314_v21  ;;  %v2294_v38 = vsub.f32 %v1874_v37, %v314_v21 }
  0xb6   :  { %584 = vadd.xlane.f32.xlu1 %v583_v13  ;;  %581 = vadd.xlane.f32.xlu0 %v580_v5 }
  0xb7   :  { %v411_v39 = vmul.f32 %v2285_v7, %v2285_v7  ;;  %v410_v16 = vmul.f32 %v2291_v15, %v2291_v15  ;;  %v539_v36 = vmul.f32 %v2288_v30, %v2288_v30  ;;  %v538_v33 = vmul.f32 %v2294_v38, %v2294_v38 }
  0xb8   :  { %v213_v24 = vpop.xlane.xlu1 %212  ;;  %v210_v32 = vpop.xlane.xlu0 %209 }
  0xb9   :  { %v285_v28 = vadd.f32 %v213_v24, %v117_v9  ;;  %v284_v25 = vadd.f32 %v210_v32, %v114_v54  ;;  %v461_v37 = vsel %vm81_vm0, %v411_v39, 0.0  ;;  %v458_v20 = vsel %vm81_vm0, %v410_v16, 0.0 }
  0xba   :  { %462 = vadd.xlane.f32.xlu1 %v461_v37  ;;  %459 = vadd.xlane.f32.xlu0 %v458_v20  ;;  %v589_v21 = vsel %vm81_vm0, %v539_v36, 0.0  ;;  %v586_v13 = vsel %vm81_vm0, %v538_v33, 0.0 }
  0xbb   :  { %v317_v17 = vmul.f32 0.0625, %v285_v28  ;;  %v316_v29 = vmul.f32 0.0625, %v284_v25 }
  0xbc   :  { %v123_v8 = vpop.xlane.xlu1 %122  ;;  %v120_v12 = vpop.xlane.xlu0 %119 }
  0xbd   :  { %v2309_v5 = vsub.f32 %v1883_v40, %v317_v17  ;;  %v2312_v9 = vsub.f32 %v1897_v44, %v317_v17  ;;  %v2315_v54 = vsub.f32 %v1888_v41, %v316_v29  ;;  %v2318_v39 = vsub.f32 %v1902_v45, %v316_v29 }
  0xbe   :  { %590 = vadd.xlane.f32.xlu1 %v589_v21  ;;  %587 = vadd.xlane.f32.xlu0 %v586_v13 }
  0xbf   :  { %v413_v16 = vmul.f32 %v2309_v5, %v2309_v5  ;;  %v412_v24 = vmul.f32 %v2315_v54, %v2315_v54  ;;  %v541_v44 = vmul.f32 %v2312_v9, %v2312_v9  ;;  %v540_v41 = vmul.f32 %v2318_v39, %v2318_v39 }
  0xc0   :  { %v219_v32 = vpop.xlane.xlu1 %218  ;;  %v216_v40 = vpop.xlane.xlu0 %215 }
  0xc1   :  { %v287_v36 = vadd.f32 %v219_v32, %v123_v8  ;;  %v286_v33 = vadd.f32 %v216_v40, %v120_v12  ;;  %v467_v45 = vsel %vm81_vm0, %v413_v16, 0.0  ;;  %v464_v28 = vsel %vm81_vm0, %v412_v24, 0.0 }
  0xc2   :  { %468 = vadd.xlane.f32.xlu1 %v467_v45  ;;  %465 = vadd.xlane.f32.xlu0 %v464_v28  ;;  %v595_v29 = vsel %vm81_vm0, %v541_v44, 0.0  ;;  %v592_v21 = vsel %vm81_vm0, %v540_v41, 0.0  ;;  %v996_v45 = vld [vmem:[%s2945_s3] sm:$0xff] }
  0xc3   :  { %v319_v25 = vmul.f32 0.0625, %v287_v36  ;;  %v318_v37 = vmul.f32 0.0625, %v286_v33  ;;  %v997_v33 = vld [vmem:[%s2945_s3 + $0x8] sm:$0xff]  ;;  %1625 = vmatprep.subr.mxu1 %v996_v45 }
  0xc4   :  { %v129_v20 = vpop.xlane.xlu1 %128  ;;  %v126_v17 = vpop.xlane.xlu0 %125  ;;  %1599 = vmatprep.subr.mxu0 %v997_v33  ;;  %1626 = vmatpush3.msra.mxu1 %v996_v45 }
  0xc5   :  { %v2333_v13 = vsub.f32 %v1911_v48, %v319_v25  ;;  %v2336_v8 = vsub.f32 %v1925_v52, %v319_v25  ;;  %v2339_v12 = vsub.f32 %v1916_v49, %v318_v37  ;;  %v2342_v16 = vsub.f32 %v1930_v53, %v318_v37  ;;  %1600 = vmatpush3.msra.mxu0 %v997_v33 }
  0xc6   :  { %596 = vadd.xlane.f32.xlu1 %v595_v29  ;;  %593 = vadd.xlane.f32.xlu0 %v592_v21 }
  0xc7   :  { %v415_v24 = vmul.f32 %v2333_v13, %v2333_v13  ;;  %v414_v32 = vmul.f32 %v2339_v12, %v2339_v12  ;;  %v543_v52 = vmul.f32 %v2336_v8, %v2336_v8  ;;  %v542_v49 = vmul.f32 %v2342_v16, %v2342_v16 }
  0xc8   :  { %v225_v40 = vpop.xlane.xlu1 %224  ;;  %v222_v48 = vpop.xlane.xlu0 %221 }
  0xc9   :  { %v289_v44 = vadd.f32 %v225_v40, %v129_v20  ;;  %v288_v41 = vadd.f32 %v222_v48, %v126_v17  ;;  %v473_v53 = vsel %vm81_vm0, %v415_v24, 0.0  ;;  %v470_v36 = vsel %vm81_vm0, %v414_v32, 0.0 }
  0xca   :  { %474 = vadd.xlane.f32.xlu1 %v473_v53  ;;  %471 = vadd.xlane.f32.xlu0 %v470_v36  ;;  %v601_v17 = vsel %vm81_vm0, %v543_v52, 0.0  ;;  %v598_v29 = vsel %vm81_vm0, %v542_v49, 0.0 }
  0xcb   :  { %v321_v28 = vmul.f32 0.0625, %v289_v44  ;;  %v320_v25 = vmul.f32 0.0625, %v288_v41 }
  0xcc   :  { %v135_v37 = vpop.xlane.xlu1 %134  ;;  %v132_v20 = vpop.xlane.xlu0 %131 }
  0xcd   :  { %v2363_v21 = vsub.f32 %v1939_v56, %v321_v28  ;;  %v2366_v24 = vsub.f32 %v1953_v60, %v321_v28  ;;  %v2369_v32 = vsub.f32 %v1944_v57, %v320_v25  ;;  %v2372_v40 = vsub.f32 %v1958_v61, %v320_v25 }
  0xce   :  { %602 = vadd.xlane.f32.xlu1 %v601_v17  ;;  %599 = vadd.xlane.f32.xlu0 %v598_v29 }
  0xcf   :  { %v417_v48 = vmul.f32 %v2363_v21, %v2363_v21  ;;  %v416_v52 = vmul.f32 %v2369_v32, %v2369_v32  ;;  %v545_v60 = vmul.f32 %v2366_v24, %v2366_v24  ;;  %v544_v57 = vmul.f32 %v2372_v40, %v2372_v40 }
  0xd0   :  { %v231_v49 = vpop.xlane.xlu1 %230  ;;  %v228_v56 = vpop.xlane.xlu0 %227 }
  0xd1   :  { %v291_v44 = vadd.f32 %v231_v49, %v135_v37  ;;  %v290_v41 = vadd.f32 %v228_v56, %v132_v20  ;;  %v479_v61 = vsel %vm81_vm0, %v417_v48, 0.0  ;;  %v476_v53 = vsel %vm81_vm0, %v416_v52, 0.0 }
  0xd2   :  { %480 = vadd.xlane.f32.xlu1 %v479_v61  ;;  %477 = vadd.xlane.f32.xlu0 %v476_v53  ;;  %v607_v25 = vsel %vm81_vm0, %v545_v60, 0.0  ;;  %v604_v17 = vsel %vm81_vm0, %v544_v57, 0.0 }
  0xd3   :  { %v323_v36 = vmul.f32 0.0625, %v291_v44  ;;  %v322_v33 = vmul.f32 0.0625, %v290_v41 }
  0xd4   :  { %v141_v45 = vpop.xlane.xlu1 %140  ;;  %v138_v28 = vpop.xlane.xlu0 %137 }
  0xd5   :  { %v2387_v29 = vsub.f32 %v1967_v3, %v323_v36  ;;  %v2390_v37 = vsub.f32 %v1981_v10, %v323_v36  ;;  %v2393_v20 = vsub.f32 %v1972_v4, %v322_v33  ;;  %v2396_v48 = vsub.f32 %v1986_v11, %v322_v33 }
  0xd6   :  { %608 = vadd.xlane.f32.xlu1 %v607_v25  ;;  %605 = vadd.xlane.f32.xlu0 %v604_v17 }
  0xd7   :  { %v419_v52 = vmul.f32 %v2387_v29, %v2387_v29  ;;  %v418_v49 = vmul.f32 %v2393_v20, %v2393_v20  ;;  %v547_v10 = vmul.f32 %v2390_v37, %v2390_v37  ;;  %v546_v4 = vmul.f32 %v2396_v48, %v2396_v48 }
  0xd8   :  { %v237_v56 = vpop.xlane.xlu1 %236  ;;  %v234_v3 = vpop.xlane.xlu0 %233 }
  0xd9   :  { %v293_v60 = vadd.f32 %v237_v56, %v141_v45  ;;  %v292_v57 = vadd.f32 %v234_v3, %v138_v28  ;;  %v485_v11 = vsel %vm81_vm0, %v419_v52, 0.0  ;;  %v482_v44 = vsel %vm81_vm0, %v418_v49, 0.0 }
  0xda   :  { %486 = vadd.xlane.f32.xlu1 %v485_v11  ;;  %483 = vadd.xlane.f32.xlu0 %v482_v44  ;;  %v613_v33 = vsel %vm81_vm0, %v547_v10, 0.0  ;;  %v610_v25 = vsel %vm81_vm0, %v546_v4, 0.0 }
  0xdb   :  { %v325_v41 = vmul.f32 0.0625, %v293_v60  ;;  %v324_v61 = vmul.f32 0.0625, %v292_v57 }
  0xdc   :  { %v147_v53 = vpop.xlane.xlu1 %146  ;;  %v144_v36 = vpop.xlane.xlu0 %143 }
  0xdd   :  { %v2411_v17 = vsub.f32 %v1995_v18, %v325_v41  ;;  %v2414_v45 = vsub.f32 %v2009_v26, %v325_v41  ;;  %v2417_v28 = vsub.f32 %v2000_v19, %v324_v61  ;;  %v2420_v52 = vsub.f32 %v2014_v27, %v324_v61 }
  0xde   :  { %614 = vadd.xlane.f32.xlu1 %v613_v33  ;;  %611 = vadd.xlane.f32.xlu0 %v610_v25 }
  0xdf   :  { %v421_v49 = vmul.f32 %v2411_v17, %v2411_v17  ;;  %v420_v56 = vmul.f32 %v2417_v28, %v2417_v28  ;;  %v549_v26 = vmul.f32 %v2414_v45, %v2414_v45  ;;  %v548_v19 = vmul.f32 %v2420_v52, %v2420_v52 }
  0xe0   :  { %v243_v3 = vpop.xlane.xlu1 %242  ;;  %v240_v18 = vpop.xlane.xlu0 %239 }
  0xe1   :  { %v295_v10 = vadd.f32 %v243_v3, %v147_v53  ;;  %v294_v4 = vadd.f32 %v240_v18, %v144_v36  ;;  %v491_v27 = vsel %vm81_vm0, %v421_v49, 0.0  ;;  %v488_v60 = vsel %vm81_vm0, %v420_v56, 0.0 }
  0xe2   :  { %492 = vadd.xlane.f32.xlu1 %v491_v27  ;;  %489 = vadd.xlane.f32.xlu0 %v488_v60  ;;  %v619_v61 = vsel %vm81_vm0, %v549_v26, 0.0  ;;  %v616_v33 = vsel %vm81_vm0, %v548_v19, 0.0 }
  0xe3   :  { %v327_v57 = vmul.f32 0.0625, %v295_v10  ;;  %v326_v11 = vmul.f32 0.0625, %v294_v4 }
  0xe4   :  { %v153_v44 = vpop.xlane.xlu1 %152  ;;  %v150_v41 = vpop.xlane.xlu0 %149 }
  0xe5   :  { %v2435_v25 = vsub.f32 %v2023_v34, %v327_v57  ;;  %v2438_v53 = vsub.f32 %v2037_v42, %v327_v57  ;;  %v2441_v36 = vsub.f32 %v2028_v35, %v326_v11  ;;  %v2444_v49 = vsub.f32 %v2042_v43, %v326_v11 }
  0xe6   :  { %620 = vadd.xlane.f32.xlu1 %v619_v61  ;;  %617 = vadd.xlane.f32.xlu0 %v616_v33 }
  0xe7   :  { %3009 = vst [vmem:[#allocation21_spill] sm:$0xff] %v2441_v36  ;;  %3010 = vst [vmem:[#allocation22_spill] sm:$0xff] %v2444_v49  ;;  %v423_v56 = vmul.f32 %v2435_v25, %v2435_v25  ;;  %v422_v3 = vmul.f32 %v2441_v36, %v2441_v36  ;;  %v551_v42 = vmul.f32 %v2438_v53, %v2438_v53 }
  0xe8   :  { %v249_v18 = vpop.xlane.xlu1 %248  ;;  %v246_v34 = vpop.xlane.xlu0 %245  ;;  %v550_v35 = vmul.f32 %v2444_v49, %v2444_v49 }
  0xe9   :  { %v297_v26 = vadd.f32 %v249_v18, %v153_v44  ;;  %v296_v19 = vadd.f32 %v246_v34, %v150_v41  ;;  %v497_v43 = vsel %vm81_vm0, %v423_v56, 0.0  ;;  %v494_v10 = vsel %vm81_vm0, %v422_v3, 0.0 }
  0xea   :  { %498 = vadd.xlane.f32.xlu1 %v497_v43  ;;  %495 = vadd.xlane.f32.xlu0 %v494_v10  ;;  %v625_v11 = vsel %vm81_vm0, %v551_v42, 0.0  ;;  %v622_v61 = vsel %vm81_vm0, %v550_v35, 0.0 }
  0xeb   :  { %v329_v4 = vmul.f32 0.0625, %v297_v26  ;;  %v328_v27 = vmul.f32 0.0625, %v296_v19 }
  0xec   :  { %v159_v60 = vpop.xlane.xlu1 %158  ;;  %v156_v57 = vpop.xlane.xlu0 %155 }
  0xed   :  { %v2459_v33 = vsub.f32 %v2051_v50, %v329_v4  ;;  %v2462_v44 = vsub.f32 %v2065_v58, %v329_v4  ;;  %v2465_v41 = vsub.f32 %v2056_v51, %v328_v27  ;;  %v2468_v56 = vsub.f32 %v2070_v59, %v328_v27 }
  0xee   :  { %626 = vadd.xlane.f32.xlu1 %v625_v11  ;;  %623 = vadd.xlane.f32.xlu0 %v622_v61 }
  0xef   :  { %3011 = vst [vmem:[#allocation23_spill] sm:$0xff] %v2459_v33  ;;  %3012 = vst [vmem:[#allocation24_spill] sm:$0xff] %v2462_v44  ;;  %v425_v3 = vmul.f32 %v2459_v33, %v2459_v33  ;;  %v424_v18 = vmul.f32 %v2465_v41, %v2465_v41  ;;  %v553_v58 = vmul.f32 %v2462_v44, %v2462_v44 }
  0xf0   :  { %3013 = vst [vmem:[#allocation25_spill] sm:$0xff] %v2465_v41  ;;  %3014 = vst [vmem:[#allocation26_spill] sm:$0xff] %v2468_v56  ;;  %v255_v34 = vpop.xlane.xlu1 %254  ;;  %v252_v50 = vpop.xlane.xlu0 %251  ;;  %v552_v51 = vmul.f32 %v2468_v56, %v2468_v56  ;;  %v3016_v41 = vld [vmem:[#allocation3_spill] sm:$0xff] }
  0xf1   :  { %v299_v42 = vadd.f32 %v255_v34, %v159_v60  ;;  %v298_v35 = vadd.f32 %v252_v50, %v156_v57  ;;  %v503_v59 = vsel %vm81_vm0, %v425_v3, 0.0  ;;  %v500_v26 = vsel %vm81_vm0, %v424_v18, 0.0  ;;  %v3018_v57 = vld [vmem:[#allocation2_spill] sm:$0xff]  ;;  %v3020_v18 = vld [vmem:[#allocation4_spill] sm:$0xff] }
  0xf2   :  { %504 = vadd.xlane.f32.xlu1 %v503_v59  ;;  %501 = vadd.xlane.f32.xlu0 %v500_v26  ;;  %v631_v27 = vsel %vm81_vm0, %v553_v58, 0.0  ;;  %v628_v11 = vsel %vm81_vm0, %v552_v51, 0.0 }
  0xf3   :  { %v331_v19 = vmul.f32 0.0625, %v299_v42  ;;  %v330_v43 = vmul.f32 0.0625, %v298_v35 }
  0xf4   :  { %v165_v10 = vpop.xlane.xlu1 %164  ;;  %v162_v4 = vpop.xlane.xlu0 %161 }
  0xf5   :  { %v2483_v61 = vsub.f32 %v2079_v6, %v331_v19  ;;  %v2486_v60 = vsub.f32 %v3016_v41, %v331_v19  ;;  %v2489_v3 = vsub.f32 %v3018_v57, %v330_v43  ;;  %v2492_v34 = vsub.f32 %v3020_v18, %v330_v43 }
  0xf6   :  { %632 = vadd.xlane.f32.xlu1 %v631_v27  ;;  %629 = vadd.xlane.f32.xlu0 %v628_v11 }
  0xf7   :  { %3015 = vst [vmem:[#allocation27_spill] sm:$0xff] %v2483_v61  ;;  %3017 = vst [vmem:[#allocation3_spill] sm:$0xff] %v2486_v60  ;;  %v427_v50 = vmul.f32 %v2483_v61, %v2483_v61  ;;  %v426_v58 = vmul.f32 %v2489_v3, %v2489_v3  ;;  %v555_v41 = vmul.f32 %v2486_v60, %v2486_v60  ;;  %v3022_v61 = vld [vmem:[#allocation5_spill] sm:$0xff] }
  0xf8   :  { %3019 = vst [vmem:[#allocation2_spill] sm:$0xff] %v2489_v3  ;;  %3021 = vst [vmem:[#allocation4_spill] sm:$0xff] %v2492_v34  ;;  %v261_v51 = vpop.xlane.xlu1 %260  ;;  %v258_v6 = vpop.xlane.xlu0 %257  ;;  %v554_v42 = vmul.f32 %v2492_v34, %v2492_v34  ;;  %v3024_v34 = vld [vmem:[#allocation7_spill] sm:$0xff] }
  0xf9   :  { %v301_v35 = vadd.f32 %v261_v51, %v165_v10  ;;  %v300_v59 = vadd.f32 %v258_v6, %v162_v4  ;;  %v509_v26 = vsel %vm81_vm0, %v427_v50, 0.0  ;;  %v506_v19 = vsel %vm81_vm0, %v426_v58, 0.0  ;;  %v3026_v4 = vld [vmem:[#allocation6_spill] sm:$0xff]  ;;  %v3028_v58 = vld [vmem:[#allocation8_spill] sm:$0xff] }
  0xfa   :  { %510 = vadd.xlane.f32.xlu1 %v509_v26  ;;  %507 = vadd.xlane.f32.xlu0 %v506_v19  ;;  %v637_v18 = vsel %vm81_vm0, %v555_v41, 0.0  ;;  %v634_v3 = vsel %vm81_vm0, %v554_v42, 0.0 }
  0xfb   :  { %v333_v43 = vmul.f32 0.0625, %v301_v35  ;;  %v332_v27 = vmul.f32 0.0625, %v300_v59 }
  0xfc   :  { %v171_v11 = vpop.xlane.xlu1 %170  ;;  %v168_v57 = vpop.xlane.xlu0 %167 }
  0xfd   :  { %v2507_v60 = vsub.f32 %v3022_v61, %v333_v43  ;;  %v2510_v10 = vsub.f32 %v3024_v34, %v333_v43  ;;  %v2513_v50 = vsub.f32 %v3026_v4, %v332_v27  ;;  %v2516_v51 = vsub.f32 %v3028_v58, %v332_v27 }
  0xfe   :  { %638 = vadd.xlane.f32.xlu1 %v637_v18  ;;  %635 = vadd.xlane.f32.xlu0 %v634_v3 }
  0xff   :  { %3023 = vst [vmem:[#allocation5_spill] sm:$0xff] %v2507_v60  ;;  %3025 = vst [vmem:[#allocation7_spill] sm:$0xff] %v2510_v10  ;;  %v429_v6 = vmul.f32 %v2507_v60, %v2507_v60  ;;  %v428_v41 = vmul.f32 %v2513_v50, %v2513_v50  ;;  %v557_v34 = vmul.f32 %v2510_v10, %v2510_v10  ;;  %v3030_v60 = vld [vmem:[#allocation9_spill] sm:$0xff] }
 0x100   :  { %3027 = vst [vmem:[#allocation6_spill] sm:$0xff] %v2513_v50  ;;  %3029 = vst [vmem:[#allocation8_spill] sm:$0xff] %v2516_v51  ;;  %v267_v42 = vpop.xlane.xlu1 %266  ;;  %v264_v61 = vpop.xlane.xlu0 %263  ;;  %v556_v35 = vmul.f32 %v2516_v51, %v2516_v51  ;;  %v3032_v51 = vld [vmem:[#allocation11_spill] sm:$0xff] }
 0x101   :  { %v303_v59 = vadd.f32 %v267_v42, %v171_v11  ;;  %v302_v26 = vadd.f32 %v264_v61, %v168_v57  ;;  %v515_v19 = vsel %vm81_vm0, %v429_v6, 0.0  ;;  %v512_v3 = vsel %vm81_vm0, %v428_v41, 0.0  ;;  %v3034_v57 = vld [vmem:[#allocation10_spill] sm:$0xff]  ;;  %v3036_v41 = vld [vmem:[#allocation12_spill] sm:$0xff] }
 0x102   :  { %516 = vadd.xlane.f32.xlu1 %v515_v19  ;;  %513 = vadd.xlane.f32.xlu0 %v512_v3  ;;  %v643_v58 = vsel %vm81_vm0, %v557_v34, 0.0  ;;  %v640_v50 = vsel %vm81_vm0, %v556_v35, 0.0 }
 0x103   :  { %v335_v43 = vmul.f32 0.0625, %v303_v59  ;;  %v334_v27 = vmul.f32 0.0625, %v302_v26 }
 0x104   :  { %v177_v18 = vpop.xlane.xlu1 %176  ;;  %v174_v4 = vpop.xlane.xlu0 %173 }
 0x105   :  { %v2531_v10 = vsub.f32 %v3030_v60, %v335_v43  ;;  %v2534_v11 = vsub.f32 %v3032_v51, %v335_v43  ;;  %v2537_v6 = vsub.f32 %v3034_v57, %v334_v27  ;;  %v2540_v42 = vsub.f32 %v3036_v41, %v334_v27  ;;  %v3038_v41 = vld [vmem:[#allocation13_spill] sm:$0xff] }
 0x106   :  { %644 = vadd.xlane.f32.xlu1 %v643_v58  ;;  %641 = vadd.xlane.f32.xlu0 %v640_v50 }
 0x107   :  { %3031 = vst [vmem:[#allocation9_spill] sm:$0xff] %v2531_v10  ;;  %3033 = vst [vmem:[#allocation11_spill] sm:$0xff] %v2534_v11  ;;  %v431_v61 = vmul.f32 %v2531_v10, %v2531_v10  ;;  %v430_v34 = vmul.f32 %v2537_v6, %v2537_v6  ;;  %v559_v51 = vmul.f32 %v2534_v11, %v2534_v11  ;;  %v3040_v10 = vld [vmem:[#allocation15_spill] sm:$0xff] }
 0x108   :  { %3035 = vst [vmem:[#allocation10_spill] sm:$0xff] %v2537_v6  ;;  %3037 = vst [vmem:[#allocation12_spill] sm:$0xff] %v2540_v42  ;;  %v273_v35 = vpop.xlane.xlu1 %272  ;;  %v270_v60 = vpop.xlane.xlu0 %269  ;;  %v558_v59 = vmul.f32 %v2540_v42, %v2540_v42 }
 0x109   :  { %v305_v26 = vadd.f32 %v273_v35, %v177_v18  ;;  %v304_v19 = vadd.f32 %v270_v60, %v174_v4  ;;  %v521_v3 = vsel %vm81_vm0, %v431_v61, 0.0  ;;  %v518_v50 = vsel %vm81_vm0, %v430_v34, 0.0  ;;  %v3042_v18 = vld [vmem:[#allocation14_spill] sm:$0xff]  ;;  %v3044_v61 = vld [vmem:[#allocation16_spill] sm:$0xff] }
 0x10a   :  { %522 = vadd.xlane.f32.xlu1 %v521_v3  ;;  %519 = vadd.xlane.f32.xlu0 %v518_v50  ;;  %v649_v58 = vsel %vm81_vm0, %v559_v51, 0.0  ;;  %v646_v57 = vsel %vm81_vm0, %v558_v59, 0.0 }
 0x10b   :  { %v337_v43 = vmul.f32 0.0625, %v305_v26  ;;  %v336_v27 = vmul.f32 0.0625, %v304_v19 }
 0x10d   :  { %v2555_v6 = vsub.f32 %v3038_v41, %v337_v43  ;;  %v2558_v11 = vsub.f32 %v3040_v10, %v337_v43  ;;  %v2561_v4 = vsub.f32 %v3042_v18, %v336_v27  ;;  %v2564_v35 = vsub.f32 %v3044_v61, %v336_v27 }
 0x10e   :  { %650 = vadd.xlane.f32.xlu1 %v649_v58  ;;  %647 = vadd.xlane.f32.xlu0 %v646_v57 }
 0x10f   :  { %3039 = vst [vmem:[#allocation13_spill] sm:$0xff] %v2555_v6  ;;  %3041 = vst [vmem:[#allocation15_spill] sm:$0xff] %v2558_v11  ;;  %v433_v34 = vmul.f32 %v2555_v6, %v2555_v6  ;;  %v432_v60 = vmul.f32 %v2561_v4, %v2561_v4  ;;  %v561_v10 = vmul.f32 %v2558_v11, %v2558_v11 }
 0x110   :  { %3043 = vst [vmem:[#allocation14_spill] sm:$0xff] %v2561_v4  ;;  %3045 = vst [vmem:[#allocation16_spill] sm:$0xff] %v2564_v35  ;;  %v560_v26 = vmul.f32 %v2564_v35, %v2564_v35 }
 0x111   :  { %v527_v51 = vsel %vm81_vm0, %v433_v34, 0.0  ;;  %v524_v59 = vsel %vm81_vm0, %v432_v60, 0.0  ;;  %v655_v19 = vsel %vm81_vm0, %v561_v10, 0.0 }
 0x112   :  { %528 = vadd.xlane.f32.xlu1 %v527_v51  ;;  %525 = vadd.xlane.f32.xlu0 %v524_v59  ;;  %v652_v3 = vsel %vm81_vm0, %v560_v26, 0.0  ;;  %v820_v59 = vlaneseq }
 0x116   :  { %656 = vadd.xlane.f32.xlu1 %v655_v19  ;;  %653 = vadd.xlane.f32.xlu0 %v652_v3  ;;  %v821_v3 = vshrl.u32 %v820_v59, 7  ;;  %v3047_v59 = vld [vmem:[#allocation17_spill] sm:$0xff] }
 0x11f   :  { %v436_v50 = vpop.xlane.xlu0 %435 }
 0x123   :  { %v439_v43 = vpop.xlane.xlu1 %438  ;;  %v564_v27 = vpop.xlane.xlu0 %563 }
 0x124   :  { %v658_v58 = vadd.f32 %v564_v27, %v436_v50 }
 0x126   :  { %v690_v57 = vmul.f32 0.0625, %v658_v58 }
 0x127   :  { %v567_v41 = vpop.xlane.xlu1 %566 }
 0x128   :  { %v722_v18 = vadd.f32 1e-05, %v690_v57  ;;  %v659_v61 = vadd.f32 %v567_v41, %v439_v43  ;;  %v926_v57 = vsub.s32 1, %v821_v3  ;;  %v786_v43 = vld [vmem:[%s2946_s1] sm:$0x3]  ;;  %v822_v41 = vsub.s32 0, %v821_v3 }
 0x12a   :  { %1651 = vrsqrt.f32 %v722_v18  ;;  %v691_v34 = vmul.f32 0.0625, %v659_v61 }
 0x12b   :  { %v445_v60 = vpop.xlane.xlu1 %444  ;;  %v442_v4 = vpop.xlane.xlu0 %441 }
 0x12c   :  { %v723_v51 = vadd.f32 1e-05, %v691_v34 }
 0x12e   :  { %1653 = vrsqrt.f32 %v723_v51  ;;  %v3046_v51 = vld [vmem:[#allocation18_spill] sm:$0xff] }
 0x12f   :  { %v573_v10 = vpop.xlane.xlu1 %572  ;;  %v570_v35 = vpop.xlane.xlu0 %569 }
 0x130   :  { %v661_v26 = vadd.f32 %v573_v10, %v445_v60  ;;  %v660_v19 = vadd.f32 %v570_v35, %v442_v4  ;;  %v787_v35 = vld [vmem:[%s2947_s2] sm:$0x3] }
 0x131   :  { %v2590_v33 = vrot.slane %v787_v35, %v926_v57 }
 0x132   :  { %v693_v6 = vmul.f32 0.0625, %v661_v26  ;;  %v692_v11 = vmul.f32 0.0625, %v660_v19  ;;  %v2588_v26 = vrot.slane %v786_v43, %v822_v41 }
 0x133   :  { %v451_v42 = vpop.xlane.xlu1 %450  ;;  %v448_v50 = vpop.xlane.xlu0 %447 }
 0x134   :  { %v725_v27 = vadd.f32 1e-05, %v693_v6  ;;  %v724_v58 = vadd.f32 1e-05, %v692_v11  ;;  %v2585_v11 = vrot.slane %v786_v43, %v926_v57 }
 0x136   :  { %1655 = vrsqrt.f32 %v725_v27 }
 0x137   :  { %v1652_v18 = vpop.eup %1651  ;;  %1657 = vrsqrt.f32 %v724_v58  ;;  %v579_v61 = vpop.xlane.xlu1 %578 }
 0x138   :  { %v576_v34 = vpop.xlane.xlu0 %575  ;;  %v663_v60 = vadd.f32 %v579_v61, %v451_v42  ;;  %v892_v6 = vmul.f32 %v1652_v18, %v3046_v51  ;;  %v788_v10 = vmul.f32 %v1652_v18, %v3047_v59  ;;  %v3048_v51 = vld [vmem:[#allocation19_spill] sm:$0xff]  ;;  %v2596_v18 = vrot.slane %v787_v35, %v822_v41 }
 0x139   :  { %v662_v4 = vadd.f32 %v576_v34, %v448_v50 }
 0x13a   :  { %v695_v19 = vmul.f32 0.0625, %v663_v60  ;;  %v928_v34 = vmul.f32 %v2585_v11, %v892_v6  ;;  %v824_v36 = vmul.f32 %v2588_v26, %v788_v10 }
 0x13b   :  { %v694_v3 = vmul.f32 0.0625, %v662_v4  ;;  %v1654_v27 = vpop.eup %1653  ;;  %v457_v58 = vpop.xlane.xlu1 %456 }
 0x13c   :  { %v454_v56 = vpop.xlane.xlu0 %453  ;;  %v727_v42 = vadd.f32 1e-05, %v695_v19  ;;  %v893_v61 = vmul.f32 %v1654_v27, %v2200_v55  ;;  %v789_v44 = vmul.f32 %v1654_v27, %v3048_v51  ;;  %v964_v55 = vadd.f32 %v2590_v33, %v928_v34 }
 0x13d   :  { %v726_v50 = vadd.f32 1e-05, %v694_v3  ;;  %v860_v3 = vadd.f32 %v2596_v18, %v824_v36 }
 0x13e   :  { %1659 = vrsqrt.f32 %v727_v42  ;;  %v929_v43 = vmul.f32 %v2585_v11, %v893_v61  ;;  %v825_v57 = vmul.f32 %v2588_v26, %v789_v44 }
 0x13f   :  { %1661 = vrsqrt.f32 %v726_v50  ;;  %v585_v60 = vpop.xlane.xlu1 %584 }
 0x140   :  { %v582_v4 = vpop.xlane.xlu0 %581  ;;  %v665_v59 = vadd.f32 %v585_v60, %v457_v58  ;;  %v965_v6 = vadd.f32 %v2590_v33, %v929_v43  ;;  %v861_v41 = vadd.f32 %v2596_v18, %v825_v57  ;;  %v3049_v43 = vld [vmem:[#allocation20_spill] sm:$0xff] }
 0x141   :  { %v664_v19 = vadd.f32 %v582_v4, %v454_v56 }
 0x142   :  { %v697_v35 = vmul.f32 0.0625, %v665_v59  ;;  %v1030_v27 = vcombine.low %v964_v55, %v965_v6  ;;  %v1256_v51 = vcombine.low %v860_v3, %v861_v41 }
 0x143   :  { %v696_v10 = vmul.f32 0.0625, %v664_v19  ;;  %v1656_v42 = vpop.eup %1655  ;;  %v463_v50 = vpop.xlane.xlu1 %462 }
 0x144   :  { %v460_v61 = vpop.xlane.xlu0 %459  ;;  %v1658_v49 = vpop.eup %1657  ;;  %v729_v44 = vadd.f32 1e-05, %v697_v35  ;;  %1601 = vmatprep.mubr.msk.f32.mxu0 %vm1046_vm1, %v1030_v27  ;;  %v895_v56 = vmul.f32 %v1656_v42, %v2216_v22  ;;  %v791_v34 = vmul.f32 %v1656_v42, %v2213_v63  ;;  %1627 = vmatprep.mubr.msk.f32.mxu1 %vm1046_vm1, %v1256_v51 }
 0x145   :  { %v728_v58 = vadd.f32 1e-05, %v696_v10  ;;  %v894_v36 = vmul.f32 %v1658_v49, %v2222_v62  ;;  %v790_v60 = vmul.f32 %v1658_v49, %v3049_v43 }
 0x146   :  { %1663 = vrsqrt.f32 %v729_v44  ;;  %v931_v4 = vmul.f32 %v2585_v11, %v895_v56  ;;  %v827_v57 = vmul.f32 %v2588_v26, %v791_v34 }
 0x147   :  { %1665 = vrsqrt.f32 %v728_v58  ;;  %v591_v59 = vpop.xlane.xlu1 %590  ;;  %v930_v55 = vmul.f32 %v2585_v11, %v894_v36  ;;  %v826_v22 = vmul.f32 %v2588_v26, %v790_v60 }
 0x148   :  { %v588_v19 = vpop.xlane.xlu0 %587  ;;  %v667_v6 = vadd.f32 %v591_v59, %v463_v50  ;;  %v967_v3 = vadd.f32 %v2590_v33, %v931_v4  ;;  %v863_v62 = vadd.f32 %v2596_v18, %v827_v57 }
 0x149   :  { %v666_v63 = vadd.f32 %v588_v19, %v460_v61  ;;  %v966_v49 = vadd.f32 %v2590_v33, %v930_v55  ;;  %v862_v41 = vadd.f32 %v2596_v18, %v826_v22 }
 0x14a   :  { %v699_v35 = vmul.f32 0.0625, %v667_v6 }
 0x14b   :  { %v698_v10 = vmul.f32 0.0625, %v666_v63  ;;  %v1660_v27 = vpop.eup %1659  ;;  %v469_v42 = vpop.xlane.xlu1 %468  ;;  %v1031_v44 = vcombine.low %v966_v49, %v967_v3  ;;  %v1257_v58 = vcombine.low %v862_v41, %v863_v62 }
 0x14c   :  { %v466_v51 = vpop.xlane.xlu0 %465  ;;  %v1662_v56 = vpop.eup %1661  ;;  %v731_v34 = vadd.f32 1e-05, %v699_v35  ;;  %v897_v50 = vmul.f32 %v1660_v27, %v2240_v23  ;;  %v793_v61 = vmul.f32 %v1660_v27, %v2237_v46 }
 0x14d   :  { %v730_v36 = vadd.f32 1e-05, %v698_v10  ;;  %1602 = vmatmul.mubr.msk.f32.vlgmr.msra.gmra.mxu0 %vm1046_vm1, %v1031_v44  ;;  %1628 = vmatmul.mubr.msk.f32.vlgmr.msra.gmra.mxu1 %vm1046_vm1, %v1257_v58  ;;  %v896_v43 = vmul.f32 %v1662_v56, %v2246_v1  ;;  %v792_v60 = vmul.f32 %v1662_v56, %v2243_v14 }
 0x14e   :  { %1667 = vrsqrt.f32 %v731_v34  ;;  %v933_v4 = vmul.f32 %v2585_v11, %v897_v50  ;;  %v829_v57 = vmul.f32 %v2588_v26, %v793_v61 }
 0x14f   :  { %1669 = vrsqrt.f32 %v730_v36  ;;  %v597_v59 = vpop.xlane.xlu1 %596  ;;  %v932_v23 = vmul.f32 %v2585_v11, %v896_v43  ;;  %v828_v46 = vmul.f32 %v2588_v26, %v792_v60 }
 0x150   :  { %v594_v19 = vpop.xlane.xlu0 %593  ;;  %v669_v55 = vadd.f32 %v597_v59, %v469_v42  ;;  %v969_v6 = vadd.f32 %v2590_v33, %v933_v4  ;;  %v865_v1 = vadd.f32 %v2596_v18, %v829_v57 }
 0x151   :  { %v668_v22 = vadd.f32 %v594_v19, %v466_v51  ;;  %v968_v14 = vadd.f32 %v2590_v33, %v932_v23  ;;  %v864_v63 = vadd.f32 %v2596_v18, %v828_v46 }
 0x152   :  { %v701_v3 = vmul.f32 0.0625, %v669_v55 }
 0x153   :  { %v700_v62 = vmul.f32 0.0625, %v668_v22  ;;  %v1664_v49 = vpop.eup %1663  ;;  %v475_v41 = vpop.xlane.xlu1 %474  ;;  %v1032_v10 = vcombine.low %v968_v14, %v969_v6  ;;  %v1258_v27 = vcombine.low %v864_v63, %v865_v1 }
 0x154   :  { %v472_v35 = vpop.xlane.xlu0 %471  ;;  %v1666_v44 = vpop.eup %1665  ;;  %v733_v58 = vadd.f32 1e-05, %v701_v3  ;;  %v899_v42 = vmul.f32 %v1664_v49, %v2264_v31  ;;  %v795_v51 = vmul.f32 %v1664_v49, %v2261_v47 }
 0x155   :  { %v732_v56 = vadd.f32 1e-05, %v700_v62  ;;  %1604 = vmatprep.mubr.msk.f32.mxu0 %vm1046_vm1, %v1032_v10  ;;  %1630 = vmatprep.mubr.msk.f32.mxu1 %vm1046_vm1, %v1258_v27  ;;  %v898_v34 = vmul.f32 %v1666_v44, %v2270_v0  ;;  %v794_v36 = vmul.f32 %v1666_v44, %v2267_v2 }
 0x156   :  { %1671 = vrsqrt.f32 %v733_v58  ;;  %v935_v50 = vmul.f32 %v2585_v11, %v899_v42  ;;  %v831_v61 = vmul.f32 %v2588_v26, %v795_v51 }
 0x157   :  { %1673 = vrsqrt.f32 %v732_v56  ;;  %v603_v43 = vpop.xlane.xlu1 %602  ;;  %v934_v31 = vmul.f32 %v2585_v11, %v898_v34  ;;  %v830_v47 = vmul.f32 %v2588_v26, %v794_v36 }
 0x158   :  { %v600_v60 = vpop.xlane.xlu0 %599  ;;  %v671_v4 = vadd.f32 %v603_v43, %v475_v41  ;;  %v971_v59 = vadd.f32 %v2590_v33, %v935_v50  ;;  %v867_v0 = vadd.f32 %v2596_v18, %v831_v61 }
 0x159   :  { %v670_v57 = vadd.f32 %v600_v60, %v472_v35  ;;  %v970_v2 = vadd.f32 %v2590_v33, %v934_v31  ;;  %v866_v19 = vadd.f32 %v2596_v18, %v830_v47 }
 0x15a   :  { %v703_v23 = vmul.f32 0.0625, %v671_v4 }
 0x15b   :  { %v702_v46 = vmul.f32 0.0625, %v670_v57  ;;  %v1668_v55 = vpop.eup %1667  ;;  %v481_v22 = vpop.xlane.xlu1 %480  ;;  %v1033_v1 = vcombine.low %v970_v2, %v971_v59  ;;  %v1259_v14 = vcombine.low %v866_v19, %v867_v0 }
 0x15c   :  { %v478_v6 = vpop.xlane.xlu0 %477  ;;  %v1670_v63 = vpop.eup %1669  ;;  %v735_v3 = vadd.f32 1e-05, %v703_v23  ;;  %v901_v49 = vmul.f32 %v1668_v55, %v2288_v30  ;;  %v797_v41 = vmul.f32 %v1668_v55, %v2285_v7 }
 0x15d   :  { %v734_v62 = vadd.f32 1e-05, %v702_v46  ;;  %1605 = vmatmul.mubr.msk.f32.gmra.mxu0 %vm1046_vm1, %v1033_v1  ;;  %1631 = vmatmul.mubr.msk.f32.gmra.mxu1 %vm1046_vm1, %v1259_v14  ;;  %v900_v35 = vmul.f32 %v1670_v63, %v2294_v38  ;;  %v796_v10 = vmul.f32 %v1670_v63, %v2291_v15 }
 0x15e   :  { %1675 = vrsqrt.f32 %v735_v3  ;;  %v937_v27 = vmul.f32 %v2585_v11, %v901_v49  ;;  %v833_v44 = vmul.f32 %v2588_v26, %v797_v41 }
 0x15f   :  { %1677 = vrsqrt.f32 %v734_v62  ;;  %v609_v58 = vpop.xlane.xlu1 %608  ;;  %v936_v30 = vmul.f32 %v2585_v11, %v900_v35  ;;  %v832_v7 = vmul.f32 %v2588_v26, %v796_v10 }
 0x160   :  { %v606_v56 = vpop.xlane.xlu0 %605  ;;  %v673_v42 = vadd.f32 %v609_v58, %v481_v22  ;;  %v973_v34 = vadd.f32 %v2590_v33, %v937_v27  ;;  %v869_v38 = vadd.f32 %v2596_v18, %v833_v44 }
 0x161   :  { %v672_v51 = vadd.f32 %v606_v56, %v478_v6  ;;  %v972_v15 = vadd.f32 %v2590_v33, %v936_v30  ;;  %v868_v36 = vadd.f32 %v2596_v18, %v832_v7 }
 0x162   :  { %v705_v50 = vmul.f32 0.0625, %v673_v42 }
 0x163   :  { %v704_v61 = vmul.f32 0.0625, %v672_v51  ;;  %v1672_v43 = vpop.eup %1671  ;;  %v487_v60 = vpop.xlane.xlu1 %486  ;;  %v1034_v47 = vcombine.low %v972_v15, %v973_v34  ;;  %v1260_v4 = vcombine.low %v868_v36, %v869_v38 }
 0x164   :  { %v484_v31 = vpop.xlane.xlu0 %483  ;;  %v1674_v57 = vpop.eup %1673  ;;  %v737_v59 = vadd.f32 1e-05, %v705_v50  ;;  %v903_v2 = vmul.f32 %v1672_v43, %v2312_v9  ;;  %v799_v19 = vmul.f32 %v1672_v43, %v2309_v5 }
 0x165   :  { %v736_v0 = vadd.f32 1e-05, %v704_v61  ;;  %1607 = vmatprep.mubr.msk.f32.mxu0 %vm1046_vm1, %v1034_v47  ;;  %1633 = vmatprep.mubr.msk.f32.mxu1 %vm1046_vm1, %v1260_v4  ;;  %v902_v23 = vmul.f32 %v1674_v57, %v2318_v39  ;;  %v798_v46 = vmul.f32 %v1674_v57, %v2315_v54 }
 0x166   :  { %1679 = vrsqrt.f32 %v737_v59  ;;  %v939_v55 = vmul.f32 %v2585_v11, %v903_v2  ;;  %v835_v22 = vmul.f32 %v2588_v26, %v799_v19 }
 0x167   :  { %1681 = vrsqrt.f32 %v736_v0  ;;  %v615_v6 = vpop.xlane.xlu1 %614  ;;  %v938_v9 = vmul.f32 %v2585_v11, %v902_v23  ;;  %v834_v5 = vmul.f32 %v2588_v26, %v798_v46 }
 0x168   :  { %v612_v1 = vpop.xlane.xlu0 %611  ;;  %v675_v14 = vadd.f32 %v615_v6, %v487_v60  ;;  %v975_v3 = vadd.f32 %v2590_v33, %v939_v55  ;;  %v871_v39 = vadd.f32 %v2596_v18, %v835_v22 }
 0x169   :  { %v674_v63 = vadd.f32 %v612_v1, %v484_v31  ;;  %v974_v54 = vadd.f32 %v2590_v33, %v938_v9  ;;  %v870_v62 = vadd.f32 %v2596_v18, %v834_v5 }
 0x16a   :  { %v707_v49 = vmul.f32 0.0625, %v675_v14 }
 0x16b   :  { %v706_v41 = vmul.f32 0.0625, %v674_v63  ;;  %v1676_v35 = vpop.eup %1675  ;;  %v493_v10 = vpop.xlane.xlu1 %492  ;;  %v1035_v44 = vcombine.low %v974_v54, %v975_v3  ;;  %v1261_v58 = vcombine.low %v870_v62, %v871_v39 }
 0x16c   :  { %v490_v27 = vpop.xlane.xlu0 %489  ;;  %v1678_v56 = vpop.eup %1677  ;;  %v739_v30 = vadd.f32 1e-05, %v707_v49  ;;  %v905_v42 = vmul.f32 %v1676_v35, %v2336_v8  ;;  %v801_v51 = vmul.f32 %v1676_v35, %v2333_v13 }
 0x16d   :  { %v738_v7 = vadd.f32 1e-05, %v706_v41  ;;  %1608 = vmatmul.mubr.msk.f32.gmra.mxu0 %vm1046_vm1, %v1035_v44  ;;  %1634 = vmatmul.mubr.msk.f32.gmra.mxu1 %vm1046_vm1, %v1261_v58  ;;  %v904_v34 = vmul.f32 %v1678_v56, %v2342_v16  ;;  %v800_v38 = vmul.f32 %v1678_v56, %v2339_v12 }
 0x16e   :  { %1683 = vrsqrt.f32 %v739_v30  ;;  %v941_v15 = vmul.f32 %v2585_v11, %v905_v42  ;;  %v837_v36 = vmul.f32 %v2588_v26, %v801_v51 }
 0x16f   :  { %1685 = vrsqrt.f32 %v738_v7  ;;  %v621_v50 = vpop.xlane.xlu1 %620  ;;  %v940_v8 = vmul.f32 %v2585_v11, %v904_v34  ;;  %v836_v13 = vmul.f32 %v2588_v26, %v800_v38 }
 0x170   :  { %v618_v61 = vpop.xlane.xlu0 %617  ;;  %v677_v43 = vadd.f32 %v621_v50, %v493_v10  ;;  %v977_v31 = vadd.f32 %v2590_v33, %v941_v15  ;;  %v873_v16 = vadd.f32 %v2596_v18, %v837_v36 }
 0x171   :  { %v676_v60 = vadd.f32 %v618_v61, %v490_v27  ;;  %v976_v12 = vadd.f32 %v2590_v33, %v940_v8  ;;  %v872_v47 = vadd.f32 %v2596_v18, %v836_v13 }
 0x172   :  { %v709_v4 = vmul.f32 0.0625, %v677_v43 }
 0x173   :  { %v708_v57 = vmul.f32 0.0625, %v676_v60  ;;  %v1680_v59 = vpop.eup %1679  ;;  %v499_v0 = vpop.xlane.xlu1 %498  ;;  %v1036_v19 = vcombine.low %v976_v12, %v977_v31  ;;  %v1262_v23 = vcombine.low %v872_v47, %v873_v16 }
 0x174   :  { %v496_v2 = vpop.xlane.xlu0 %495  ;;  %v1682_v46 = vpop.eup %1681  ;;  %v741_v55 = vadd.f32 1e-05, %v709_v4  ;;  %v907_v6 = vmul.f32 %v1680_v59, %v2366_v24  ;;  %v803_v1 = vmul.f32 %v1680_v59, %v2363_v21 }
 0x175   :  { %v740_v22 = vadd.f32 1e-05, %v708_v57  ;;  %1610 = vmatprep.mubr.msk.f32.mxu0 %vm1046_vm1, %v1036_v19  ;;  %1636 = vmatprep.mubr.msk.f32.mxu1 %vm1046_vm1, %v1262_v23  ;;  %v906_v9 = vmul.f32 %v1682_v46, %v2372_v40  ;;  %v802_v5 = vmul.f32 %v1682_v46, %v2369_v32 }
 0x176   :  { %1687 = vrsqrt.f32 %v741_v55  ;;  %v943_v14 = vmul.f32 %v2585_v11, %v907_v6  ;;  %v839_v63 = vmul.f32 %v2588_v26, %v803_v1 }
 0x177   :  { %1689 = vrsqrt.f32 %v740_v22  ;;  %v627_v3 = vpop.xlane.xlu1 %626  ;;  %v942_v24 = vmul.f32 %v2585_v11, %v906_v9  ;;  %v838_v21 = vmul.f32 %v2588_v26, %v802_v5 }
 0x178   :  { %v624_v39 = vpop.xlane.xlu0 %623  ;;  %v679_v54 = vadd.f32 %v627_v3, %v499_v0  ;;  %v979_v49 = vadd.f32 %v2590_v33, %v943_v14  ;;  %v875_v40 = vadd.f32 %v2596_v18, %v839_v63 }
 0x179   :  { %v678_v62 = vadd.f32 %v624_v39, %v496_v2  ;;  %v978_v32 = vadd.f32 %v2590_v33, %v942_v24  ;;  %v874_v41 = vadd.f32 %v2596_v18, %v838_v21 }
 0x17a   :  { %v711_v35 = vmul.f32 0.0625, %v679_v54 }
 0x17b   :  { %v710_v10 = vmul.f32 0.0625, %v678_v62  ;;  %v1684_v27 = vpop.eup %1683  ;;  %v505_v44 = vpop.xlane.xlu1 %504  ;;  %v1037_v56 = vcombine.low %v978_v32, %v979_v49  ;;  %v1263_v30 = vcombine.low %v874_v41, %v875_v40 }
 0x17c   :  { %v502_v58 = vpop.xlane.xlu0 %501  ;;  %v1686_v7 = vpop.eup %1685  ;;  %v743_v42 = vadd.f32 1e-05, %v711_v35  ;;  %v909_v34 = vmul.f32 %v1684_v27, %v2390_v37  ;;  %v805_v38 = vmul.f32 %v1684_v27, %v2387_v29 }
 0x17d   :  { %v742_v51 = vadd.f32 1e-05, %v710_v10  ;;  %1611 = vmatmul.mubr.msk.f32.gmra.mxu0 %vm1046_vm1, %v1037_v56  ;;  %1637 = vmatmul.mubr.msk.f32.gmra.mxu1 %vm1046_vm1, %v1263_v30  ;;  %v908_v15 = vmul.f32 %v1686_v7, %v2396_v48  ;;  %v804_v36 = vmul.f32 %v1686_v7, %v2393_v20  ;;  %v3050_v30 = vld [vmem:[#allocation22_spill] sm:$0xff] }
 0x17e   :  { %1691 = vrsqrt.f32 %v743_v42  ;;  %v945_v50 = vmul.f32 %v2585_v11, %v909_v34  ;;  %v841_v61 = vmul.f32 %v2588_v26, %v805_v38  ;;  %v3051_v42 = vld [vmem:[#allocation21_spill] sm:$0xff] }
 0x17f   :  { %1693 = vrsqrt.f32 %v742_v51  ;;  %v633_v8 = vpop.xlane.xlu1 %632  ;;  %v944_v37 = vmul.f32 %v2585_v11, %v908_v15  ;;  %v840_v29 = vmul.f32 %v2588_v26, %v804_v36 }
 0x180   :  { %v630_v13 = vpop.xlane.xlu0 %629  ;;  %v681_v43 = vadd.f32 %v633_v8, %v505_v44  ;;  %v981_v31 = vadd.f32 %v2590_v33, %v945_v50  ;;  %v877_v48 = vadd.f32 %v2596_v18, %v841_v61 }
 0x181   :  { %v680_v60 = vadd.f32 %v630_v13, %v502_v58  ;;  %v980_v20 = vadd.f32 %v2590_v33, %v944_v37  ;;  %v876_v16 = vadd.f32 %v2596_v18, %v840_v29 }
 0x182   :  { %v713_v12 = vmul.f32 0.0625, %v681_v43 }
 0x183   :  { %v712_v47 = vmul.f32 0.0625, %v680_v60  ;;  %v1688_v4 = vpop.eup %1687  ;;  %v511_v57 = vpop.xlane.xlu1 %510  ;;  %v1038_v0 = vcombine.low %v980_v20, %v981_v31  ;;  %v1264_v2 = vcombine.low %v876_v16, %v877_v48 }
 0x184   :  { %v508_v59 = vpop.xlane.xlu0 %507  ;;  %v1690_v19 = vpop.eup %1689  ;;  %v745_v23 = vadd.f32 1e-05, %v713_v12  ;;  %v911_v55 = vmul.f32 %v1688_v4, %v2414_v45  ;;  %v807_v22 = vmul.f32 %v1688_v4, %v2411_v17 }
 0x185   :  { %v744_v46 = vadd.f32 1e-05, %v712_v47  ;;  %1613 = vmatprep.mubr.msk.f32.mxu0 %vm1046_vm1, %v1038_v0  ;;  %1639 = vmatprep.mubr.msk.f32.mxu1 %vm1046_vm1, %v1264_v2  ;;  %v910_v6 = vmul.f32 %v1690_v19, %v2420_v52  ;;  %v806_v1 = vmul.f32 %v1690_v19, %v2417_v28  ;;  %v3053_v2 = vld [vmem:[#allocation23_spill] sm:$0xff] }
 0x186   :  { %1695 = vrsqrt.f32 %v745_v23  ;;  %v947_v9 = vmul.f32 %v2585_v11, %v911_v55  ;;  %v843_v5 = vmul.f32 %v2588_v26, %v807_v22  ;;  %v3054_v23 = vld [vmem:[#allocation26_spill] sm:$0xff]  ;;  %v3055_v55 = vld [vmem:[#allocation25_spill] sm:$0xff] }
 0x187   :  { %1697 = vrsqrt.f32 %v744_v46  ;;  %v639_v14 = vpop.xlane.xlu1 %638  ;;  %v946_v45 = vmul.f32 %v2585_v11, %v910_v6  ;;  %v842_v17 = vmul.f32 %v2588_v26, %v806_v1 }
 0x188   :  { %v636_v63 = vpop.xlane.xlu0 %635  ;;  %v683_v3 = vadd.f32 %v639_v14, %v511_v57  ;;  %v983_v24 = vadd.f32 %v2590_v33, %v947_v9  ;;  %v879_v52 = vadd.f32 %v2596_v18, %v843_v5 }
 0x189   :  { %v682_v39 = vadd.f32 %v636_v63, %v508_v59  ;;  %v982_v28 = vadd.f32 %v2590_v33, %v946_v45  ;;  %v878_v21 = vadd.f32 %v2596_v18, %v842_v17  ;;  %v3052_v59 = vld [vmem:[#allocation24_spill] sm:$0xff] }
 0x18a   :  { %v715_v54 = vmul.f32 0.0625, %v683_v3 }
 0x18b   :  { %v714_v62 = vmul.f32 0.0625, %v682_v39  ;;  %v1692_v49 = vpop.eup %1691  ;;  %v517_v40 = vpop.xlane.xlu1 %516  ;;  %v1039_v41 = vcombine.low %v982_v28, %v983_v24  ;;  %v1265_v35 = vcombine.low %v878_v21, %v879_v52 }
 0x18c   :  { %v514_v32 = vpop.xlane.xlu0 %513  ;;  %v1694_v10 = vpop.eup %1693  ;;  %v747_v27 = vadd.f32 1e-05, %v715_v54  ;;  %v913_v58 = vmul.f32 %v1692_v49, %v2438_v53  ;;  %v809_v56 = vmul.f32 %v1692_v49, %v2435_v25 }
 0x18d   :  { %v746_v44 = vadd.f32 1e-05, %v714_v62  ;;  %1614 = vmatmul.mubr.msk.f32.gmra.mxu0 %vm1046_vm1, %v1039_v41  ;;  %1640 = vmatmul.mubr.msk.f32.gmra.mxu1 %vm1046_vm1, %v1265_v35  ;;  %v912_v7 = vmul.f32 %v1694_v10, %v3050_v30  ;;  %v808_v51 = vmul.f32 %v1694_v10, %v3051_v42  ;;  %v3058_v30 = vld [vmem:[#allocation4_spill] sm:$0xff]  ;;  %v3059_v42 = vld [vmem:[#allocation2_spill] sm:$0xff] }
 0x18e   :  { %1699 = vrsqrt.f32 %v747_v27  ;;  %v949_v34 = vmul.f32 %v2585_v11, %v913_v58  ;;  %v845_v38 = vmul.f32 %v2588_v26, %v809_v56  ;;  %v3056_v27 = vld [vmem:[#allocation3_spill] sm:$0xff] }
 0x18f   :  { %1701 = vrsqrt.f32 %v746_v44  ;;  %v645_v15 = vpop.xlane.xlu1 %644  ;;  %v948_v53 = vmul.f32 %v2585_v11, %v912_v7  ;;  %v844_v25 = vmul.f32 %v2588_v26, %v808_v51  ;;  %v3057_v58 = vld [vmem:[#allocation27_spill] sm:$0xff] }
 0x190   :  { %v642_v36 = vpop.xlane.xlu0 %641  ;;  %v685_v50 = vadd.f32 %v645_v15, %v517_v40  ;;  %v985_v8 = vadd.f32 %v2590_v33, %v949_v34  ;;  %v881_v13 = vadd.f32 %v2596_v18, %v845_v38 }
 0x191   :  { %v684_v61 = vadd.f32 %v642_v36, %v514_v32  ;;  %v984_v37 = vadd.f32 %v2590_v33, %v948_v53  ;;  %v880_v29 = vadd.f32 %v2596_v18, %v844_v25 }
 0x192   :  { %v717_v43 = vmul.f32 0.0625, %v685_v50 }
 0x193   :  { %v716_v60 = vmul.f32 0.0625, %v684_v61  ;;  %v1696_v31 = vpop.eup %1695  ;;  %v523_v48 = vpop.xlane.xlu1 %522  ;;  %v1040_v16 = vcombine.low %v984_v37, %v985_v8  ;;  %v1266_v12 = vcombine.low %v880_v29, %v881_v13 }
 0x194   :  { %v520_v20 = vpop.xlane.xlu0 %519  ;;  %v1698_v47 = vpop.eup %1697  ;;  %v749_v4 = vadd.f32 1e-05, %v717_v43  ;;  %v915_v0 = vmul.f32 %v1696_v31, %v3052_v59  ;;  %v811_v19 = vmul.f32 %v1696_v31, %v3053_v2  ;;  %v3061_v59 = vld [vmem:[#allocation5_spill] sm:$0xff]  ;;  %v3062_v2 = vld [vmem:[#allocation8_spill] sm:$0xff] }
 0x195   :  { %v748_v57 = vadd.f32 1e-05, %v716_v60  ;;  %1616 = vmatprep.mubr.msk.f32.mxu0 %vm1046_vm1, %v1040_v16  ;;  %1642 = vmatprep.mubr.msk.f32.mxu1 %vm1046_vm1, %v1266_v12  ;;  %v914_v46 = vmul.f32 %v1698_v47, %v3054_v23  ;;  %v810_v22 = vmul.f32 %v1698_v47, %v3055_v55  ;;  %v3063_v23 = vld [vmem:[#allocation6_spill] sm:$0xff] }
 0x196   :  { %1703 = vrsqrt.f32 %v749_v4  ;;  %v951_v6 = vmul.f32 %v2585_v11, %v915_v0  ;;  %v847_v1 = vmul.f32 %v2588_v26, %v811_v19  ;;  %v3060_v4 = vld [vmem:[#allocation7_spill] sm:$0xff] }
 0x197   :  { %1705 = vrsqrt.f32 %v748_v57  ;;  %v651_v9 = vpop.xlane.xlu1 %650  ;;  %v950_v14 = vmul.f32 %v2585_v11, %v914_v46  ;;  %v846_v63 = vmul.f32 %v2588_v26, %v810_v22 }
 0x198   :  { %v648_v5 = vpop.xlane.xlu0 %647  ;;  %v687_v45 = vadd.f32 %v651_v9, %v523_v48  ;;  %v987_v3 = vadd.f32 %v2590_v33, %v951_v6  ;;  %v883_v39 = vadd.f32 %v2596_v18, %v847_v1 }
 0x199   :  { %v686_v17 = vadd.f32 %v648_v5, %v520_v20  ;;  %v986_v24 = vadd.f32 %v2590_v33, %v950_v14  ;;  %v882_v52 = vadd.f32 %v2596_v18, %v846_v63 }
 0x19a   :  { %v719_v28 = vmul.f32 0.0625, %v687_v45 }
 0x19b   :  { %v718_v21 = vmul.f32 0.0625, %v686_v17  ;;  %v1700_v54 = vpop.eup %1699  ;;  %v529_v62 = vpop.xlane.xlu1 %528  ;;  %v1041_v40 = vcombine.low %v986_v24, %v987_v3  ;;  %v1267_v32 = vcombine.low %v882_v52, %v883_v39  ;;  %v3064_v24 = vld [vmem:[#allocation11_spill] sm:$0xff] }
 0x19c   :  { %v526_v49 = vpop.xlane.xlu0 %525  ;;  %v1702_v41 = vpop.eup %1701  ;;  %v751_v35 = vadd.f32 1e-05, %v719_v28  ;;  %v917_v44 = vmul.f32 %v1700_v54, %v3056_v27  ;;  %v813_v56 = vmul.f32 %v1700_v54, %v3057_v58  ;;  %v3065_v28 = vld [vmem:[#allocation9_spill] sm:$0xff]  ;;  %v3066_v54 = vld [vmem:[#allocation12_spill] sm:$0xff] }
 0x19d   :  { %v750_v10 = vadd.f32 1e-05, %v718_v21  ;;  %1617 = vmatmul.mubr.msk.f32.gmra.mxu0 %vm1046_vm1, %v1041_v40  ;;  %1643 = vmatmul.mubr.msk.f32.gmra.mxu1 %vm1046_vm1, %v1267_v32  ;;  %v916_v7 = vmul.f32 %v1702_v41, %v3058_v30  ;;  %v812_v51 = vmul.f32 %v1702_v41, %v3059_v42 }
 0x19e   :  { %1707 = vrsqrt.f32 %v751_v35  ;;  %v953_v34 = vmul.f32 %v2585_v11, %v917_v44  ;;  %v849_v38 = vmul.f32 %v2588_v26, %v813_v56 }
 0x19f   :  { %1709 = vrsqrt.f32 %v750_v10  ;;  %v657_v15 = vpop.xlane.xlu1 %656  ;;  %v952_v53 = vmul.f32 %v2585_v11, %v916_v7  ;;  %v848_v25 = vmul.f32 %v2588_v26, %v812_v51 }
 0x1a0   :  { %v654_v36 = vpop.xlane.xlu0 %653  ;;  %v689_v50 = vadd.f32 %v657_v15, %v529_v62  ;;  %v989_v8 = vadd.f32 %v2590_v33, %v953_v34  ;;  %v885_v13 = vadd.f32 %v2596_v18, %v849_v38  ;;  %v3068_v34 = vld [vmem:[#allocation15_spill] sm:$0xff]  ;;  %v3069_v15 = vld [vmem:[#allocation13_spill] sm:$0xff] }
 0x1a1   :  { %v688_v61 = vadd.f32 %v654_v36, %v526_v49  ;;  %v988_v37 = vadd.f32 %v2590_v33, %v952_v53  ;;  %v884_v29 = vadd.f32 %v2596_v18, %v848_v25  ;;  %v3067_v49 = vld [vmem:[#allocation10_spill] sm:$0xff]  ;;  %v3070_v53 = vld [vmem:[#allocation16_spill] sm:$0xff] }
 0x1a2   :  { %v721_v43 = vmul.f32 0.0625, %v689_v50  ;;  %v3071_v50 = vld [vmem:[#allocation14_spill] sm:$0xff] }
 0x1a3   :  { %v720_v60 = vmul.f32 0.0625, %v688_v61  ;;  %v1704_v31 = vpop.eup %1703  ;;  %v1042_v48 = vcombine.low %v988_v37, %v989_v8  ;;  %v1268_v20 = vcombine.low %v884_v29, %v885_v13 }
 0x1a4   :  { %v1706_v16 = vpop.eup %1705  ;;  %v753_v12 = vadd.f32 1e-05, %v721_v43  ;;  %v919_v57 = vmul.f32 %v1704_v31, %v3060_v4  ;;  %v815_v0 = vmul.f32 %v1704_v31, %v3061_v59 }
 0x1a5   :  { %v752_v47 = vadd.f32 1e-05, %v720_v60  ;;  %1619 = vmatprep.mubr.msk.f32.mxu0 %vm1046_vm1, %v1042_v48  ;;  %1645 = vmatprep.mubr.msk.f32.mxu1 %vm1046_vm1, %v1268_v20  ;;  %v918_v19 = vmul.f32 %v1706_v16, %v3062_v2  ;;  %v814_v46 = vmul.f32 %v1706_v16, %v3063_v23 }
 0x1a6   :  { %1711 = vrsqrt.f32 %v753_v12  ;;  %v955_v55 = vmul.f32 %v2585_v11, %v919_v57  ;;  %v851_v22 = vmul.f32 %v2588_v26, %v815_v0 }
 0x1a7   :  { %1713 = vrsqrt.f32 %v752_v47  ;;  %v954_v6 = vmul.f32 %v2585_v11, %v918_v19  ;;  %v850_v1 = vmul.f32 %v2588_v26, %v814_v46 }
 0x1a8   :  { %v991_v9 = vadd.f32 %v2590_v33, %v955_v55  ;;  %v887_v5 = vadd.f32 %v2596_v18, %v851_v22 }
 0x1a9   :  { %v990_v14 = vadd.f32 %v2590_v33, %v954_v6  ;;  %v886_v63 = vadd.f32 %v2596_v18, %v850_v1 }
 0x1ab   :  { %v1708_v45 = vpop.eup %1707  ;;  %v1043_v17 = vcombine.low %v990_v14, %v991_v9  ;;  %v1269_v3 = vcombine.low %v886_v63, %v887_v5 }
 0x1ac   :  { %v1710_v39 = vpop.eup %1709  ;;  %v921_v52 = vmul.f32 %v1708_v45, %v3064_v24  ;;  %v817_v21 = vmul.f32 %v1708_v45, %v3065_v28 }
 0x1ad   :  { %1620 = vmatmul.mubr.msk.f32.gmra.mxu0 %vm1046_vm1, %v1043_v17  ;;  %1646 = vmatmul.mubr.msk.f32.gmra.mxu1 %vm1046_vm1, %v1269_v3  ;;  %v920_v62 = vmul.f32 %v1710_v39, %v3066_v54  ;;  %v816_v40 = vmul.f32 %v1710_v39, %v3067_v49 }
 0x1ae   :  { %v957_v32 = vmul.f32 %v2585_v11, %v921_v52  ;;  %v853_v41 = vmul.f32 %v2588_v26, %v817_v21 }
 0x1af   :  { %v956_v35 = vmul.f32 %v2585_v11, %v920_v62  ;;  %v852_v10 = vmul.f32 %v2588_v26, %v816_v40 }
 0x1b0   :  { %v993_v27 = vadd.f32 %v2590_v33, %v957_v32  ;;  %v889_v44 = vadd.f32 %v2596_v18, %v853_v41 }
 0x1b1   :  { %v992_v58 = vadd.f32 %v2590_v33, %v956_v35  ;;  %v888_v56 = vadd.f32 %v2596_v18, %v852_v10 }
 0x1b3   :  { %v1712_v30 = vpop.eup %1711  ;;  %v1044_v7 = vcombine.low %v992_v58, %v993_v27  ;;  %v1270_v42 = vcombine.low %v888_v56, %v889_v44 }
 0x1b4   :  { %v1714_v51 = vpop.eup %1713  ;;  %v923_v38 = vmul.f32 %v1712_v30, %v3068_v34  ;;  %v819_v36 = vmul.f32 %v1712_v30, %v3069_v15 }
 0x1b5   :  { %1622 = vmatprep.mubr.msk.f32.mxu0 %vm1046_vm1, %v1044_v7  ;;  %1648 = vmatprep.mubr.msk.f32.mxu1 %vm1046_vm1, %v1270_v42  ;;  %v922_v25 = vmul.f32 %v1714_v51, %v3070_v53  ;;  %v818_v61 = vmul.f32 %v1714_v51, %v3071_v50 }
 0x1b6   :  { %v959_v8 = vmul.f32 %v2585_v11, %v923_v38  ;;  %v855_v13 = vmul.f32 %v2588_v26, %v819_v36 }
 0x1b7   :  { %v958_v37 = vmul.f32 %v2585_v11, %v922_v25  ;;  %v854_v29 = vmul.f32 %v2588_v26, %v818_v61 }
 0x1b8   :  { %v995_v43 = vadd.f32 %v2590_v33, %v959_v8  ;;  %v891_v60 = vadd.f32 %v2596_v18, %v855_v13 }
 0x1b9   :  { %v994_v31 = vadd.f32 %v2590_v33, %v958_v37  ;;  %v890_v48 = vadd.f32 %v2596_v18, %v854_v29 }
 0x1bb   :  { %v1045_v20 = vcombine.low %v994_v31, %v995_v43  ;;  %v1271_v16 = vcombine.low %v890_v48, %v891_v60 }
 0x1bd   :  { %1623 = vmatmul.mubr.msk.f32.gmra.mxu0 %vm1046_vm1, %v1045_v20  ;;  %1649 = vmatmul.mubr.msk.f32.gmra.mxu1 %vm1046_vm1, %v1271_v16 }
 0x20d   :  { %v1603_v12 = vpop.f32.mrf.mxu0  ;;  %v1629_v47 = vpop.f32.mrf.mxu1 }
 0x20e   :  { %v1376_v4 = vadd.f32 %v1629_v47, %v1603_v12 }
 0x20f   :  { %v1145_v11 = vpop.f32.mrf.mxu0  ;;  %v1370_v57 = vpop.f32.mrf.mxu1 }
 0x210   :  { %v1466_v26 = vcombine.high %v1376_v4, %v1376_v4  ;;  %1499 = vst.msk [vmem:[%s2948_s4 + $0x8] sm:$0xf] %vm81_vm0, %v1376_v4  ;;  %v1371_v33 = vadd.f32 %v1370_v57, %v1145_v11 }
 0x212   :  { %1500 = vst.msk [vmem:[%s2948_s4 + $0xc] sm:$0xf] %vm81_vm0, %v1466_v26  ;;  %v1465_v18 = vcombine.high %v1371_v33, %v1371_v33  ;;  %1497 = vst.msk [vmem:[%s2948_s4] sm:$0xf] %vm81_vm0, %v1371_v33 }
 0x214   :  { %1498 = vst.msk [vmem:[%s2948_s4 + $0x4] sm:$0xf] %vm81_vm0, %v1465_v18 }
 0x21d   :  { %v1606_v59 = vpop.f32.mrf.mxu0  ;;  %v1632_v0 = vpop.f32.mrf.mxu1 }
 0x21e   :  { %v1386_v2 = vadd.f32 %v1632_v0, %v1606_v59 }
 0x21f   :  { %v1155_v19 = vpop.f32.mrf.mxu0  ;;  %v1380_v23 = vpop.f32.mrf.mxu1 }
 0x220   :  { %v1468_v46 = vcombine.high %v1386_v2, %v1386_v2  ;;  %1503 = vst.msk [vmem:[%s2948_s4 + $0x18] sm:$0xf] %vm81_vm0, %v1386_v2  ;;  %v1381_v55 = vadd.f32 %v1380_v23, %v1155_v19 }
 0x222   :  { %1504 = vst.msk [vmem:[%s2948_s4 + $0x1c] sm:$0xf] %vm81_vm0, %v1468_v46  ;;  %v1467_v22 = vcombine.high %v1381_v55, %v1381_v55  ;;  %1501 = vst.msk [vmem:[%s2948_s4 + $0x10] sm:$0xf] %vm81_vm0, %v1381_v55 }
 0x224   :  { %1502 = vst.msk [vmem:[%s2948_s4 + $0x14] sm:$0xf] %vm81_vm0, %v1467_v22 }
 0x22d   :  { %v1609_v6 = vpop.f32.mrf.mxu0  ;;  %v1635_v1 = vpop.f32.mrf.mxu1 }
 0x22e   :  { %v1396_v9 = vadd.f32 %v1635_v1, %v1609_v6 }
 0x22f   :  { %v1165_v5 = vpop.f32.mrf.mxu0  ;;  %v1390_v14 = vpop.f32.mrf.mxu1 }
 0x230   :  { %v1470_v63 = vcombine.high %v1396_v9, %v1396_v9  ;;  %1507 = vst.msk [vmem:[%s2948_s4 + $0x28] sm:$0xf] %vm81_vm0, %v1396_v9  ;;  %v1391_v45 = vadd.f32 %v1390_v14, %v1165_v5 }
 0x232   :  { %1508 = vst.msk [vmem:[%s2948_s4 + $0x2c] sm:$0xf] %vm81_vm0, %v1470_v63  ;;  %v1469_v17 = vcombine.high %v1391_v45, %v1391_v45  ;;  %1505 = vst.msk [vmem:[%s2948_s4 + $0x20] sm:$0xf] %vm81_vm0, %v1391_v45 }
 0x234   :  { %1506 = vst.msk [vmem:[%s2948_s4 + $0x24] sm:$0xf] %vm81_vm0, %v1469_v17 }
 0x23d   :  { %v1612_v3 = vpop.f32.mrf.mxu0  ;;  %v1638_v39 = vpop.f32.mrf.mxu1 }
 0x23e   :  { %v1406_v24 = vadd.f32 %v1638_v39, %v1612_v3 }
 0x23f   :  { %v1175_v52 = vpop.f32.mrf.mxu0  ;;  %v1400_v28 = vpop.f32.mrf.mxu1 }
 0x240   :  { %v1472_v21 = vcombine.high %v1406_v24, %v1406_v24  ;;  %1511 = vst.msk [vmem:[%s2948_s4 + $0x38] sm:$0xf] %vm81_vm0, %v1406_v24  ;;  %v1401_v54 = vadd.f32 %v1400_v28, %v1175_v52 }
 0x242   :  { %1512 = vst.msk [vmem:[%s2948_s4 + $0x3c] sm:$0xf] %vm81_vm0, %v1472_v21  ;;  %v1471_v62 = vcombine.high %v1401_v54, %v1401_v54  ;;  %1509 = vst.msk [vmem:[%s2948_s4 + $0x30] sm:$0xf] %vm81_vm0, %v1401_v54 }
 0x244   :  { %1510 = vst.msk [vmem:[%s2948_s4 + $0x34] sm:$0xf] %vm81_vm0, %v1471_v62 }
 0x24d   :  { %v1615_v49 = vpop.f32.mrf.mxu0  ;;  %v1641_v40 = vpop.f32.mrf.mxu1 }
 0x24e   :  { %v1416_v32 = vadd.f32 %v1641_v40, %v1615_v49 }
 0x24f   :  { %v1185_v41 = vpop.f32.mrf.mxu0  ;;  %v1410_v35 = vpop.f32.mrf.mxu1 }
 0x250   :  { %v1474_v10 = vcombine.high %v1416_v32, %v1416_v32  ;;  %1515 = vst.msk [vmem:[%s2948_s4 + $0x48] sm:$0xf] %vm81_vm0, %v1416_v32  ;;  %v1411_v27 = vadd.f32 %v1410_v35, %v1185_v41 }
 0x252   :  { %1516 = vst.msk [vmem:[%s2948_s4 + $0x4c] sm:$0xf] %vm81_vm0, %v1474_v10  ;;  %v1473_v44 = vcombine.high %v1411_v27, %v1411_v27  ;;  %1513 = vst.msk [vmem:[%s2948_s4 + $0x40] sm:$0xf] %vm81_vm0, %v1411_v27 }
 0x254   :  { %1514 = vst.msk [vmem:[%s2948_s4 + $0x44] sm:$0xf] %vm81_vm0, %v1473_v44 }
 0x25d   :  { %v1618_v58 = vpop.f32.mrf.mxu0  ;;  %v1644_v56 = vpop.f32.mrf.mxu1 }
 0x25e   :  { %v1426_v30 = vadd.f32 %v1644_v56, %v1618_v58 }
 0x25f   :  { %v1195_v7 = vpop.f32.mrf.mxu0  ;;  %v1420_v42 = vpop.f32.mrf.mxu1 }
 0x260   :  { %v1476_v51 = vcombine.high %v1426_v30, %v1426_v30  ;;  %1519 = vst.msk [vmem:[%s2948_s4 + $0x58] sm:$0xf] %vm81_vm0, %v1426_v30  ;;  %v1421_v34 = vadd.f32 %v1420_v42, %v1195_v7 }
 0x262   :  { %1520 = vst.msk [vmem:[%s2948_s4 + $0x5c] sm:$0xf] %vm81_vm0, %v1476_v51  ;;  %v1475_v38 = vcombine.high %v1421_v34, %v1421_v34  ;;  %1517 = vst.msk [vmem:[%s2948_s4 + $0x50] sm:$0xf] %vm81_vm0, %v1421_v34 }
 0x264   :  { %1518 = vst.msk [vmem:[%s2948_s4 + $0x54] sm:$0xf] %vm81_vm0, %v1475_v38 }
 0x26d   :  { %v1621_v15 = vpop.f32.mrf.mxu0  ;;  %v1647_v36 = vpop.f32.mrf.mxu1 }
 0x26e   :  { %v1436_v53 = vadd.f32 %v1647_v36, %v1621_v15 }
 0x26f   :  { %v1205_v25 = vpop.f32.mrf.mxu0  ;;  %v1430_v50 = vpop.f32.mrf.mxu1 }
 0x270   :  { %v1478_v61 = vcombine.high %v1436_v53, %v1436_v53  ;;  %1523 = vst.msk [vmem:[%s2948_s4 + $0x68] sm:$0xf] %vm81_vm0, %v1436_v53  ;;  %v1431_v8 = vadd.f32 %v1430_v50, %v1205_v25 }
 0x272   :  { %1524 = vst.msk [vmem:[%s2948_s4 + $0x6c] sm:$0xf] %vm81_vm0, %v1478_v61  ;;  %v1477_v13 = vcombine.high %v1431_v8, %v1431_v8  ;;  %1521 = vst.msk [vmem:[%s2948_s4 + $0x60] sm:$0xf] %vm81_vm0, %v1431_v8 }
 0x274   :  { %1522 = vst.msk [vmem:[%s2948_s4 + $0x64] sm:$0xf] %vm81_vm0, %v1477_v13 }
 0x27d   :  { %v1624_v37 = vpop.f32.mrf.mxu0  ;;  %v1650_v29 = vpop.f32.mrf.mxu1 }
 0x27e   :  { %v1446_v43 = vadd.f32 %v1650_v29, %v1624_v37 }
 0x27f   :  { %v1215_v60 = vpop.f32.mrf.mxu0  ;;  %v1440_v31 = vpop.f32.mrf.mxu1 }
 0x280   :  { %v1480_v48 = vcombine.high %v1446_v43, %v1446_v43  ;;  %1527 = vst.msk [vmem:[%s2948_s4 + $0x78] sm:$0xf] %vm81_vm0, %v1446_v43  ;;  %v1441_v20 = vadd.f32 %v1440_v31, %v1215_v60 }
 0x282   :  { %1528 = vst.msk [vmem:[%s2948_s4 + $0x7c] sm:$0xf] %vm81_vm0, %v1480_v48  ;;  %v1479_v16 = vcombine.high %v1441_v20, %v1441_v20  ;;  %1525 = vst.msk [vmem:[%s2948_s4 + $0x70] sm:$0xf] %vm81_vm0, %v1441_v20 }
 0x284   :  { %1526 = vst.msk [vmem:[%s2948_s4 + $0x74] sm:$0xf] %vm81_vm0, %v1479_v16 }

</bundles_post_ra>
